<compile_context>
chip_gen: v6e
topology: v6e:2x2x1
jax: 0.10.0
libtpu: 0.0.40
codegen_flags: <defaults>
</compile_context>

<pallas_src>
import jax
import jax.numpy as jnp
from jax.experimental import pallas as pl
from jax.experimental.pallas import tpu as pltpu

EPS = 1e-5                      # nn.BatchNorm1d default eps
COMPUTE_DTYPE = jnp.bfloat16    # MXU operand dtype (f32 accumulation)
STORE_DTYPE = jnp.bfloat16      # HBM dtype for inter-stage activations
MAX_TILE_L = 4096               # lane-tile cap


# ----------------------------------------------------------------------------
# Per-generation sizing
# ----------------------------------------------------------------------------
def _vmem_limit_bytes():
    """~3/4 of physical VMEM, capped at 96 MiB (≈48 MiB on v7x, 96 MiB on
    v5e/v6e which have 128 MiB of VMEM)."""
    try:
        cap = int(pltpu.get_tpu_info().vmem_capacity_bytes)
    except Exception:                       # conservative fallback (v7x-sized)
        cap = 64 * 1024 * 1024
    return int(min(cap * 3 // 4, 96 * 1024 * 1024))


def _pick_tile_l(length, c_max, cond_ch, vmem_limit, cap=MAX_TILE_L):
    """Largest lane tile (multiple of 128) dividing `length` that fits the
    per-tile VMEM budget derived from the channel counts."""
    if length <= 128:
        return length                       # full-array tile
    # Bytes per lane of L: double-buffered bf16 I/O tiles (x, sc, y/yproj,
    # cond) plus ~8 f32 (C, TL) in-kernel temporaries.
    per_lane = 8 * (3 * c_max + cond_ch) + 32 * c_max
    budget = vmem_limit // 2
    max_tl = max(128, min(cap, (budget // per_lane) // 128 * 128))
    if length <= max_tl:
        return length
    t = max_tl
    while t >= 128:
        if length % t == 0:
            return t
        t -= 128
    return 128                              # length is a multiple of 128 here


def _compiler_params(vmem_limit):
    return pltpu.CompilerParams(
        dimension_semantics=("parallel", "parallel"),
        vmem_limit_bytes=vmem_limit)


# ----------------------------------------------------------------------------
# Kernels
# ----------------------------------------------------------------------------
def _emit_partial_stats(stats_ref, yf):
    """Write lane-dense per-tile [sum; sum_sq] of shape (2, C)."""
    s = jnp.sum(yf, axis=1, keepdims=True)          # (C, 1)
    sq = jnp.sum(yf * yf, axis=1, keepdims=True)    # (C, 1)
    stats_ref[0, 0, :, :] = jnp.concatenate([s, sq], axis=1).T   # (2, C)


def _make_pos_kernel(has_mask):
    """x0 = W_pos @ positions + b_pos  (+ lane-dense partial BN moments)."""

    def kernel(*refs):
        it = iter(refs)
        pos_ref = next(it)                           # (1, P, TL) bf16
        mask_ref = next(it) if has_mask else None    # (1, 1, TL) f32
        w_ref = next(it)                             # (C1, P)    bf16
        b_ref = next(it)                             # (C1, 1)    f32
        y_ref = next(it)                             # (1, C1, TL)
        stats_ref = next(it)                         # (1, 1, 2, C1)

        y = jnp.dot(w_ref[...], pos_ref[0],
                    preferred_element_type=jnp.float32) + b_ref[...]
        y_ref[0] = y.astype(y_ref.dtype)
        yf = y * mask_ref[0] if has_mask else y      # stats from f32 accumulator
        _emit_partial_stats(stats_ref, yf)

    return kernel


def _make_stage_kernel(has_residual, has_proj, has_bias, emit_stats, has_mask):
    """Generic stage: BN (precomputed global stats) -> *gamma+beta -> ReLU ->
    fused 1x1 conv(s) [-> +residual] [-> partial BN moments of the output]."""

    def kernel(*refs):
        it = iter(refs)
        x_ref = next(it)                             # (1, Cin, TL)  bf16
        st_ref = next(it)                            # (Cin, 2) f32  [mean, inv_std]
        cond_ref = next(it)                          # (1, K, TL)    bf16
        mask_ref = next(it) if has_mask else None    # (1, 1, TL)    f32
        sc_ref = next(it) if has_residual else None  # (1, Cout, TL) bf16
        wgb_ref = next(it)                           # (2*Cin, K)    bf16 fused gamma|beta
        bgb_ref = next(it)                           # (2*Cin, 1)    f32
        wmain_ref = next(it)                         # (Cout or 2*Cout, Cin) bf16
        bmain_ref = next(it) if has_bias else None   # (Cout, 1)     f32
        y_ref = next(it)                             # (1, Cout, TL)
        yproj_ref = next(it) if has_proj else None   # (1, Cout, TL)
        stats_ref = next(it) if emit_stats else None # (1, 1, 2, Cout)

        # BatchNorm1d (affine=False) with global batch statistics.
        x = x_ref[0].astype(jnp.float32)             # (Cin, TL)
        mean = st_ref[:, 0:1]
        inv_std = st_ref[:, 1:2]
        xn = (x - mean) * inv_std

        # gamma & beta 1x1 convs fused into one MXU matmul.
        gb = jnp.dot(wgb_ref[...], cond_ref[0],
                     preferred_element_type=jnp.float32) + bgb_ref[...]
        c_in = x.shape[0]
        gamma = gb[:c_in]
        beta = gb[c_in:]

        h = jnp.maximum(xn * gamma + beta, 0.0).astype(COMPUTE_DTYPE)

        # Main (and optionally projection) 1x1 conv as one fused matmul.
        c_out = y_ref.shape[1]
        y_all = jnp.dot(wmain_ref[...], h, preferred_element_type=jnp.float32)
        y = y_all[:c_out]
        if has_bias:
            y = y + bmain_ref[...]
        if has_residual:
            y = y + sc_ref[0].astype(jnp.float32)
        y_ref[0] = y.astype(y_ref.dtype)
        if has_proj:
            # Projection conv applied to the post-CBN/ReLU activations,
            # exactly as in the PyTorch forward.
            yproj_ref[0] = y_all[c_out:].astype(yproj_ref.dtype)

        if emit_stats:
            yf = y * mask_ref[0] if has_mask else y
            _emit_partial_stats(stats_ref, yf)

    return kernel


# ----------------------------------------------------------------------------
# pallas_call wrappers
# ----------------------------------------------------------------------------
def _pos_call(pos, w_pos, b_pos, *, mask, tl, vmem_limit):
    n, p, l = pos.shape
    t = l // tl
    c1 = w_pos.shape[0]
    kernel = _make_pos_kernel(mask is not None)

    in_arrays = [pos]
    in_specs = [pl.BlockSpec((1, p, tl), lambda ni, ti: (ni, 0, ti))]
    if mask is not None:
        in_arrays.append(mask)
        in_specs.append(pl.BlockSpec((1, 1, tl), lambda ni, ti: (0, 0, ti)))
    in_arrays += [w_pos, b_pos]
    in_specs += [pl.BlockSpec(w_pos.shape, lambda ni, ti: (0, 0)),
                 pl.BlockSpec(b_pos.shape, lambda ni, ti: (0, 0))]

    return pl.pallas_call(
        kernel,
        out_shape=(jax.ShapeDtypeStruct((n, c1, l), STORE_DTYPE),
                   jax.ShapeDtypeStruct((n, t, 2, c1), jnp.float32)),
        grid=(n, t),
        in_specs=in_specs,
        out_specs=(pl.BlockSpec((1, c1, tl), lambda ni, ti: (ni, 0, ti)),
                   pl.BlockSpec((1, 1, 2, c1), lambda ni, ti: (ni, ti, 0, 0))),
        compiler_params=_compiler_params(vmem_limit),
    )(*in_arrays)


def _stage_call(x, stats, cond, wgb, bgb, wmain, *, mask=None, sc=None,
                has_proj=False, bmain=None, emit_stats=True,
                out_dtype=STORE_DTYPE, tl, vmem_limit):
    n, c_in, l = x.shape
    t = l // tl
    k = cond.shape[1]
    c_out = wmain.shape[0] // 2 if has_proj else wmain.shape[0]

    kernel = _make_stage_kernel(sc is not None, has_proj, bmain is not None,
                                emit_stats, mask is not None)

    in_arrays = [x, stats, cond]
    in_specs = [
        pl.BlockSpec((1, c_in, tl), lambda ni, ti: (ni, 0, ti)),
        pl.BlockSpec(stats.shape, lambda ni, ti: (0, 0)),
        pl.BlockSpec((1, k, tl), lambda ni, ti: (ni, 0, ti)),
    ]
    if mask is not None:
        in_arrays.append(mask)
        in_specs.append(pl.BlockSpec((1, 1, tl), lambda ni, ti: (0, 0, ti)))
    if sc is not None:
        in_arrays.append(sc)
        in_specs.append(pl.BlockSpec((1, c_out, tl), lambda ni, ti: (ni, 0, ti)))
    in_arrays += [wgb, bgb, wmain]
    in_specs += [pl.BlockSpec(wgb.shape, lambda ni, ti: (0, 0)),
                 pl.BlockSpec(bgb.shape, lambda ni, ti: (0, 0)),
                 pl.BlockSpec(wmain.shape, lambda ni, ti: (0, 0))]
    if bmain is not None:
        in_arrays.append(bmain)
        in_specs.append(pl.BlockSpec(bmain.shape, lambda ni, ti: (0, 0)))

    out_shape = [jax.ShapeDtypeStruct((n, c_out, l), out_dtype)]
    out_specs = [pl.BlockSpec((1, c_out, tl), lambda ni, ti: (ni, 0, ti))]
    if has_proj:
        out_shape.append(jax.ShapeDtypeStruct((n, c_out, l), STORE_DTYPE))
        out_specs.append(pl.BlockSpec((1, c_out, tl), lambda ni, ti: (ni, 0, ti)))
    if emit_stats:
        out_shape.append(jax.ShapeDtypeStruct((n, t, 2, c_out), jnp.float32))
        out_specs.append(
            pl.BlockSpec((1, 1, 2, c_out), lambda ni, ti: (ni, ti, 0, 0)))

    return pl.pallas_call(
        kernel,
        out_shape=tuple(out_shape),
        grid=(n, t),
        in_specs=in_specs,
        out_specs=tuple(out_specs),
        compiler_params=_compiler_params(vmem_limit),
    )(*in_arrays)


# ----------------------------------------------------------------------------
# BatchNorm stat finalization (tiny, plain JAX)
# ----------------------------------------------------------------------------
def _finalize_stats(partial, count):
    """partial: (n, t, 2, C) lane-dense [sum, sum_sq] -> (C, 2) [mean, inv_std]."""
    s = jnp.sum(partial[:, :, 0, :], axis=(0, 1))
    sq = jnp.sum(partial[:, :, 1, :], axis=(0, 1))
    mean = s / count
    var = jnp.maximum(sq / count - mean * mean, 0.0)  # single-pass variance
    inv_std = jax.lax.rsqrt(var + EPS)
    return jnp.stack([mean, inv_std], axis=1).astype(jnp.float32)   # (C, 2)


# ----------------------------------------------------------------------------
# Parameter preparation (packing / bf16 casts done once, outside jit)
# ----------------------------------------------------------------------------
def prepare_decoder_params(params):
    (w_pos, b_pos,
     g1a_w, g1a_b, b1a_w, b1a_b, w1_c1, w1_proj,
     g1b_w, g1b_b, b1b_w, b1b_b, w1_c2,
     g2a_w, g2a_b, b2a_w, b2a_b, w2_c1,
     g2b_w, g2b_b, b2b_w, b2b_b, w2_c2,
     gf_w, gf_b, bf_w, bf_b, w_out, b_out) = params
    cd = COMPUTE_DTYPE

    def gb(gw, gbias, bw, bbias):
        # Fuse gamma & beta 1x1 convs of one CBN into a single MXU matmul.
        return (jnp.concatenate([gw, bw], axis=0).astype(cd),
                jnp.concatenate([gbias, bbias], axis=0)
                   .reshape(-1, 1).astype(jnp.float32))

    return dict(
        w_pos=w_pos.astype(cd),
        b_pos=b_pos.reshape(-1, 1).astype(jnp.float32),
        gb1a=gb(g1a_w, g1a_b, b1a_w, b1a_b),
        # main conv1 and projection conv share the same RHS -> fuse them.
        w1=jnp.concatenate([w1_c1, w1_proj], axis=0).astype(cd),
        gb1b=gb(g1b_w, g1b_b, b1b_w, b1b_b),
        w1b=w1_c2.astype(cd),
        gb2a=gb(g2a_w, g2a_b, b2a_w, b2a_b),
        w2=w2_c1.astype(cd),
        gb2b=gb(g2b_w, g2b_b, b2b_w, b2b_b),
        w2b=w2_c2.astype(cd),
        gbf=gb(gf_w, gf_b, bf_w, bf_b),
        w_out=w_out.astype(cd),
        b_out=b_out.reshape(-1, 1).astype(jnp.float32),
    )


# ----------------------------------------------------------------------------
# Full decoder forward
# ----------------------------------------------------------------------------
def conditional_residual_decoder(positions, conditions, prep):
    """positions: (N, P, L) f32 NCL; conditions: (N, K, L) f32 NCL.
    Returns (N, C_OUT, L) f32 NCL."""
    n, _, l_real = positions.shape
    k = conditions.shape[1]
    cd = COMPUTE_DTYPE

    pos = positions.astype(cd)
    cond = conditions.astype(cd)

    # Pad L to a multiple of 128 (mask keeps the BN statistics exact).
    pad = 0 if (l_real <= 128 or l_real % 128 == 0) else (-l_real) % 128
    l = l_real + pad
    mask = None
    if pad:
        pos = jnp.pad(pos, ((0, 0), (0, 0), (0, pad)))
        cond = jnp.pad(cond, ((0, 0), (0, 0), (0, pad)))
        mask = (jnp.arange(l) < l_real).astype(jnp.float32).reshape(1, 1, l)

    c_max = max(prep['w_pos'].shape[0], prep['w1b'].shape[0],
                prep['w_out'].shape[0])
    vmem_limit = _vmem_limit_bytes()
    tl = _pick_tile_l(l, c_max, k, vmem_limit)
    count = float(n * l_real)

    # Stage 0: position_conv1d_block (Conv1d k=1, bias=True).
    x0, p0 = _pos_call(pos, prep['w_pos'], prep['b_pos'], mask=mask,
                       tl=tl, vmem_limit=vmem_limit)
    st0 = _finalize_stats(p0, count)

    # ConditionalResidual1dBlock #1 (projection=True, fused main+proj matmul).
    wgb, bgb = prep['gb1a']
    h1, sc1, p1 = _stage_call(x0, st0, cond, wgb, bgb, prep['w1'], mask=mask,
                              has_proj=True, tl=tl, vmem_limit=vmem_limit)
    st1 = _finalize_stats(p1, count)
    wgb, bgb = prep['gb1b']
    x1, p2 = _stage_call(h1, st1, cond, wgb, bgb, prep['w1b'], mask=mask,
                         sc=sc1, tl=tl, vmem_limit=vmem_limit)
    st2 = _finalize_stats(p2, count)

    # ConditionalResidual1dBlock #2 (projection=False).
    wgb, bgb = prep['gb2a']
    h3, p3 = _stage_call(x1, st2, cond, wgb, bgb, prep['w2'], mask=mask,
                         tl=tl, vmem_limit=vmem_limit)
    st3 = _finalize_stats(p3, count)
    wgb, bgb = prep['gb2b']
    x2, p4 = _stage_call(h3, st3, cond, wgb, bgb, prep['w2b'], mask=mask,
                         sc=x1, tl=tl, vmem_limit=vmem_limit)
    st4 = _finalize_stats(p4, count)

    # conv1d_block: CBN -> ReLU -> Conv1d(k=1, bias=True).
    # TODO(synk): the original nn.Sequential cannot forward `conditions` to
    # ConditionalBatchNorm1d (it would raise); the intended CBN(x, conditions)
    # semantics are implemented here.
    wgb, bgb = prep['gbf']
    (out,) = _stage_call(x2, st4, cond, wgb, bgb, prep['w_out'],
                         bmain=prep['b_out'], emit_stats=False,
                         out_dtype=jnp.float32, tl=tl, vmem_limit=vmem_limit)
    if pad:
        out = out[:, :, :l_real]
    return out


# ----------------------------------------------------------------------------
# Parameters (PyTorch Conv1d layout: weight (Cout, Cin), bias (Cout,))
# ----------------------------------------------------------------------------
def make_params(key, p_ch, cond_ch, c1, c2, c_out):
    ks = iter(jax.random.split(key, 32))

    def w(shape, scale=0.1):
        return jax.random.normal(next(ks), shape, jnp.float32) * scale

    return [
        # position_conv1d_block
        w((c1, p_ch)), w((c1,)),
        # block 1: CBN-a (gamma_w, gamma_b, beta_w, beta_b), conv1, projection
        w((c1, cond_ch)), w((c1,)), w((c1, cond_ch)), w((c1,)),
        w((c2, c1)), w((c2, c1)),
        # block 1: CBN-b, conv2
        w((c2, cond_ch)), w((c2,)), w((c2, cond_ch)), w((c2,)),
        w((c2, c2)),
        # block 2: CBN-a, conv1
        w((c2, cond_ch)), w((c2,)), w((c2, cond_ch)), w((c2,)),
        w((c2, c2)),
        # block 2: CBN-b, conv2
        w((c2, cond_ch)), w((c2,)), w((c2, cond_ch)), w((c2,)),
        w((c2, c2)),
        # final block: CBN, output conv
        w((c2, cond_ch)), w((c2,)), w((c2, cond_ch)), w((c2,)),
        w((c_out, c2)), w((c_out,)),
    ]
    # NOTE: latent_conv1d_block from __init__ is never used in forward(),
    # so no parameters are created for it.


# ----------------------------------------------------------------------------
# Pure-JAX reference mirroring the kernel math (bf16 MXU operands, bf16
# inter-stage storage, f32 stats before the store cast) for verification.
# ----------------------------------------------------------------------------
def _reference(positions, conditions, params):
    (w_pos, b_pos,
     g1a_w, g1a_b, b1a_w, b1a_b, w1_c1, w1_proj,
     g1b_w, g1b_b, b1b_w, b1b_b, w1_c2,
     g2a_w, g2a_b, b2a_w, b2a_b, w2_c1,
     g2b_w, g2b_b, b2b_w, b2b_b, w2_c2,
     gf_w, gf_b, bf_w, bf_b, w_out, b_out) = params
    cd, sd = COMPUTE_DTYPE, STORE_DTYPE
    cond = conditions

    def conv(wt, x, b=None):
        y = jnp.einsum('oc,ncl->nol', wt.astype(cd), x.astype(cd),
                       preferred_element_type=jnp.float32)
        if b is not None:
            y = y + b.astype(jnp.float32)[None, :, None]
        return y

    def stats_of(y32):
        cnt = y32.shape[0] * y32.shape[2]
        mean = jnp.sum(y32, axis=(0, 2)) / cnt
        var = jnp.maximum(jnp.sum(y32 * y32, axis=(0, 2)) / cnt - mean * mean, 0.0)
        return mean, jax.lax.rsqrt(var + EPS)

    def cbn_relu(x_sd, st, gw, gbias, bw, bbias):
        mean, inv = st
        xn = (x_sd.astype(jnp.float32) - mean[None, :, None]) * inv[None, :, None]
        gamma = conv(gw, cond, gbias)
        beta = conv(bw, cond, bbias)
        return jnp.maximum(xn * gamma + beta, 0.0)

    x0_32 = conv(w_pos, positions, b_pos)
    x0 = x0_32.astype(sd)
    h1 = cbn_relu(x0, stats_of(x0_32), g1a_w, g1a_b, b1a_w, b1a_b)
    sc1 = conv(w1_proj, h1).astype(sd)
    h1b_32 = conv(w1_c1, h1)
    h1b = h1b_32.astype(sd)
    h2 = cbn_relu(h1b, stats_of(h1b_32), g1b_w, g1b_b, b1b_w, b1b_b)
    x1_32 = conv(w1_c2, h2) + sc1.astype(jnp.float32)
    x1 = x1_32.astype(sd)
    h3 = cbn_relu(x1, stats_of(x1_32), g2a_w, g2a_b, b2a_w, b2a_b)
    h3b_32 = conv(w2_c1, h3)
    h3b = h3b_32.astype(sd)
    h4 = cbn_relu(h3b, stats_of(h3b_32), g2b_w, g2b_b, b2b_w, b2b_b)
    x2_32 = conv(w2_c2, h4) + x1.astype(jnp.float32)
    x2 = x2_32.astype(sd)
    h5 = cbn_relu(x2, stats_of(x2_32), gf_w, gf_b, bf_w, bf_b)
    return conv(w_out, h5, b_out)


if __name__ == "__main__":
    # Small shapes: batch=2, seq=16, position-channels=4, condition-channels=8,
    # hidden channels 16 -> 32 -> 32, output channels 4.
    N, L = 2, 16
    P_CH, COND_CH = 4, 8
    C1, C2, C_OUT = 16, 32, 4

    key = jax.random.PRNGKey(0)
    k_pos, k_cond, k_par, k_pos2, k_cond2 = jax.random.split(key, 5)
    positions = jax.random.normal(k_pos, (N, P_CH, L), jnp.float32)
    conditions = jax.random.normal(k_cond, (N, COND_CH, L), jnp.float32)
    params = make_params(k_par, P_CH, COND_CH, C1, C2, C_OUT)
    prep = prepare_decoder_params(params)     # pack & bf16-cast weights once

    decoder = jax.jit(conditional_residual_decoder)
    out = jax.block_until_ready(decoder(positions, conditions, prep))
    ref = _reference(positions, conditions, params)
    assert out.shape == (N, C_OUT, L), out.shape
    assert jnp.allclose(out, ref, atol=2e-2, rtol=2e-2), (
        float(jnp.max(jnp.abs(out - ref))))

    # Second case exercises the padded / masked-stats path (L % 128 != 0).
    L2 = 200
    positions2 = jax.random.normal(k_pos2, (N, P_CH, L2), jnp.float32)
    conditions2 = jax.random.normal(k_cond2, (N, COND_CH, L2), jnp.float32)
    out2 = jax.block_until_ready(decoder(positions2, conditions2, prep))
    ref2 = _reference(positions2, conditions2, params)
    assert out2.shape == (N, C_OUT, L2), out2.shape
    assert jnp.allclose(out2, ref2, atol=2e-2, rtol=2e-2), (
        float(jnp.max(jnp.abs(out2 - ref2))))

    print("KERNEL_OK")
</pallas_src>

<mosaic_0001>
module attributes {stable_mosaic.version = 11 : i64} {
  func.func @kernel(%arg0: i32, %arg1: i32, %arg2: memref<1x4x16xbf16, #tpu.memory_space<vmem>>, %arg3: memref<16x4xbf16, #tpu.memory_space<vmem>>, %arg4: memref<16x1xf32, #tpu.memory_space<vmem>>, %arg5: memref<1x16x16xbf16, #tpu.memory_space<vmem>>, %arg6: memref<1x1x2x16xf32, #tpu.memory_space<vmem>>) attributes {dimension_semantics = [#tpu.dimension_semantics<parallel>, #tpu.dimension_semantics<parallel>], iteration_bounds = array<i64: 2, 1>, scalar_prefetch = 0 : i64, scratch_operands = 0 : i64, tpu.core_type = #tpu.core_type<tc>, window_params = [{transform_indices = @transform_0, window_bounds = array<i64: 1, 4, 16>}, {pipeline_mode = #tpu.pipeline_mode<synchronous>, transform_indices = @transform_1, window_bounds = array<i64: 16, 4>}, {pipeline_mode = #tpu.pipeline_mode<synchronous>, transform_indices = @transform_2, window_bounds = array<i64: 16, 1>}, {transform_indices = @transform_3, window_bounds = array<i64: 1, 16, 16>}, {transform_indices = @transform_4, window_bounds = array<i64: 1, 1, 2, 16>}]} {
    %c0 = arith.constant 0 : index
    %c0_0 = arith.constant 0 : index
    %0 = vector.load %arg3[%c0, %c0_0] : memref<16x4xbf16, #tpu.memory_space<vmem>>, vector<16x4xbf16>
    %c0_1 = arith.constant 0 : index
    %c0_2 = arith.constant 0 : index
    %c0_3 = arith.constant 0 : index
    %1 = vector.load %arg2[%c0_1, %c0_2, %c0_3] : memref<1x4x16xbf16, #tpu.memory_space<vmem>>, vector<1x4x16xbf16>
    %2 = vector.shape_cast %1 : vector<1x4x16xbf16> to vector<4x16xbf16>
    %cst = arith.constant dense<0.000000e+00> : vector<16x16xf32>
    %3 = tpu.matmul %0, %2, %cst {dimension_numbers = #tpu.dot_dimension_numbers<[1], [0], [0], [1], [0, 0, 1, 1], [], []>} : vector<16x4xbf16>, vector<4x16xbf16>, vector<16x16xf32> -> vector<16x16xf32>
    %c0_4 = arith.constant 0 : index
    %c0_5 = arith.constant 0 : index
    %4 = vector.load %arg4[%c0_4, %c0_5] : memref<16x1xf32, #tpu.memory_space<vmem>>, vector<16x1xf32>
    %5 = vector.broadcast %4 : vector<16x1xf32> to vector<16x16xf32>
    %6 = arith.addf %3, %5 : vector<16x16xf32>
    %7 = arith.truncf %6 : vector<16x16xf32> to vector<16x16xbf16>
    %c0_6 = arith.constant 0 : index
    %c0_7 = arith.constant 0 : index
    %c0_8 = arith.constant 0 : index
    %8 = vector.load %arg5[%c0_6, %c0_7, %c0_8] : memref<1x16x16xbf16, #tpu.memory_space<vmem>>, vector<1x16x16xbf16>
    %9 = vector.shape_cast %8 : vector<1x16x16xbf16> to vector<16x16xbf16>
    %10 = vector.shape_cast %7 : vector<16x16xbf16> to vector<1x16x16xbf16>
    tpu.vector_store %arg5[%c0_6, %c0_7, %c0_8], %10 {strides = array<i32>} : memref<1x16x16xbf16, #tpu.memory_space<vmem>>, vector<1x16x16xbf16>,
    %cst_9 = arith.constant dense<0.000000e+00> : vector<16xf32>
    %11 = vector.multi_reduction <add>, %6, %cst_9 [1] : vector<16x16xf32> to vector<16xf32>
    %12 = vector.shape_cast %11 : vector<16xf32> to vector<16x1xf32>
    %13 = arith.mulf %6, %6 : vector<16x16xf32>
    %cst_10 = arith.constant dense<0.000000e+00> : vector<16xf32>
    %14 = vector.multi_reduction <add>, %13, %cst_10 [1] : vector<16x16xf32> to vector<16xf32>
    %15 = vector.shape_cast %14 : vector<16xf32> to vector<16x1xf32>
    %16 = tpu.concatenate %12, %15 in 1 : vector<16x1xf32>, vector<16x1xf32> -> vector<16x2xf32>
    %17 = tpu.transpose %16, [1, 0] : vector<16x2xf32> -> vector<2x16xf32>
    %c0_11 = arith.constant 0 : index
    %c0_12 = arith.constant 0 : index
    %c0_13 = arith.constant 0 : index
    %c0_14 = arith.constant 0 : index
    %18 = vector.load %arg6[%c0_11, %c0_12, %c0_13, %c0_14] : memref<1x1x2x16xf32, #tpu.memory_space<vmem>>, vector<1x1x2x16xf32>
    %19 = vector.shape_cast %18 : vector<1x1x2x16xf32> to vector<2x16xf32>
    %20 = vector.shape_cast %17 : vector<2x16xf32> to vector<1x1x2x16xf32>
    tpu.vector_store %arg6[%c0_11, %c0_12, %c0_13, %c0_14], %20 {strides = array<i32>} : memref<1x1x2x16xf32, #tpu.memory_space<vmem>>, vector<1x1x2x16xf32>,
    return
  }
  func.func @transform_0(%arg0: i32, %arg1: i32) -> (i32, i32, i32) {
    %c0_i32 = arith.constant 0 : i32
    %c0_i32_0 = arith.constant 0 : i32
    return %arg0, %c0_i32, %arg1 : i32, i32, i32
  }
  func.func @transform_1(%arg0: i32, %arg1: i32) -> (i32, i32) {
    %c0_i32 = arith.constant 0 : i32
    %c0_i32_0 = arith.constant 0 : i32
    %c0_i32_1 = arith.constant 0 : i32
    return %c0_i32, %c0_i32_0 : i32, i32
  }
  func.func @transform_2(%arg0: i32, %arg1: i32) -> (i32, i32) {
    %c0_i32 = arith.constant 0 : i32
    %c0_i32_0 = arith.constant 0 : i32
    %c0_i32_1 = arith.constant 0 : i32
    return %c0_i32, %c0_i32_0 : i32, i32
  }
  func.func @transform_3(%arg0: i32, %arg1: i32) -> (i32, i32, i32) {
    %c0_i32 = arith.constant 0 : i32
    %c0_i32_0 = arith.constant 0 : i32
    return %arg0, %c0_i32, %arg1 : i32, i32, i32
  }
  func.func @transform_4(%arg0: i32, %arg1: i32) -> (i32, i32, i32, i32) {
    %c0_i32 = arith.constant 0 : i32
    %c0_i32_0 = arith.constant 0 : i32
    %c0_i32_1 = arith.constant 0 : i32
    return %arg0, %arg1, %c0_i32, %c0_i32_0 : i32, i32, i32, i32
  }
}

module attributes {stable_mosaic.version = 11 : i64} {
  func.func @kernel(%arg0: i32, %arg1: i32, %arg2: memref<1x16x16xbf16, #tpu.memory_space<vmem>>, %arg3: memref<16x2xf32, #tpu.memory_space<vmem>>, %arg4: memref<1x8x16xbf16, #tpu.memory_space<vmem>>, %arg5: memref<32x8xbf16, #tpu.memory_space<vmem>>, %arg6: memref<32x1xf32, #tpu.memory_space<vmem>>, %arg7: memref<64x16xbf16, #tpu.memory_space<vmem>>, %arg8: memref<1x32x16xbf16, #tpu.memory_space<vmem>>, %arg9: memref<1x32x16xbf16, #tpu.memory_space<vmem>>, %arg10: memref<1x1x2x32xf32, #tpu.memory_space<vmem>>) attributes {dimension_semantics = [#tpu.dimension_semantics<parallel>, #tpu.dimension_semantics<parallel>], iteration_bounds = array<i64: 2, 1>, scalar_prefetch = 0 : i64, scratch_operands = 0 : i64, tpu.core_type = #tpu.core_type<tc>, window_params = [{transform_indices = @transform_0, window_bounds = array<i64: 1, 16, 16>}, {pipeline_mode = #tpu.pipeline_mode<synchronous>, transform_indices = @transform_1, window_bounds = array<i64: 16, 2>}, {transform_indices = @transform_2, window_bounds = array<i64: 1, 8, 16>}, {pipeline_mode = #tpu.pipeline_mode<synchronous>, transform_indices = @transform_3, window_bounds = array<i64: 32, 8>}, {pipeline_mode = #tpu.pipeline_mode<synchronous>, transform_indices = @transform_4, window_bounds = array<i64: 32, 1>}, {pipeline_mode = #tpu.pipeline_mode<synchronous>, transform_indices = @transform_5, window_bounds = array<i64: 64, 16>}, {transform_indices = @transform_6, window_bounds = array<i64: 1, 32, 16>}, {transform_indices = @transform_7, window_bounds = array<i64: 1, 32, 16>}, {transform_indices = @transform_8, window_bounds = array<i64: 1, 1, 2, 32>}]} {
    %c0 = arith.constant 0 : index
    %c0_0 = arith.constant 0 : index
    %c0_1 = arith.constant 0 : index
    %0 = vector.load %arg2[%c0, %c0_0, %c0_1] : memref<1x16x16xbf16, #tpu.memory_space<vmem>>, vector<1x16x16xbf16>
    %1 = vector.shape_cast %0 : vector<1x16x16xbf16> to vector<16x16xbf16>
    %2 = arith.extf %1 : vector<16x16xbf16> to vector<16x16xf32>
    %c0_2 = arith.constant 0 : index
    %c0_3 = arith.constant 0 : index
    %3 = vector.load %arg3[%c0_2, %c0_3] : memref<16x2xf32, #tpu.memory_space<vmem>>, vector<16x1xf32>
    %c0_4 = arith.constant 0 : index
    %c1 = arith.constant 1 : index
    %4 = vector.load %arg3[%c0_4, %c1] : memref<16x2xf32, #tpu.memory_space<vmem>>, vector<16x1xf32>
    %5 = vector.broadcast %3 : vector<16x1xf32> to vector<16x16xf32>
    %6 = arith.subf %2, %5 : vector<16x16xf32>
    %7 = vector.broadcast %4 : vector<16x1xf32> to vector<16x16xf32>
    %8 = arith.mulf %6, %7 : vector<16x16xf32>
    %c0_5 = arith.constant 0 : index
    %c0_6 = arith.constant 0 : index
    %9 = vector.load %arg5[%c0_5, %c0_6] : memref<32x8xbf16, #tpu.memory_space<vmem>>, vector<32x8xbf16>
    %c0_7 = arith.constant 0 : index
    %c0_8 = arith.constant 0 : index
    %c0_9 = arith.constant 0 : index
    %10 = vector.load %arg4[%c0_7, %c0_8, %c0_9] : memref<1x8x16xbf16, #tpu.memory_space<vmem>>, vector<1x8x16xbf16>
    %11 = vector.shape_cast %10 : vector<1x8x16xbf16> to vector<8x16xbf16>
    %cst = arith.constant dense<0.000000e+00> : vector<32x16xf32>
    %12 = tpu.matmul %9, %11, %cst {dimension_numbers = #tpu.dot_dimension_numbers<[1], [0], [0], [1], [0, 0, 1, 1], [], []>} : vector<32x8xbf16>, vector<8x16xbf16>, vector<32x16xf32> -> vector<32x16xf32>
    %c0_10 = arith.constant 0 : index
    %c0_11 = arith.constant 0 : index
    %13 = vector.load %arg6[%c0_10, %c0_11] : memref<32x1xf32, #tpu.memory_space<vmem>>, vector<32x1xf32>
    %14 = vector.broadcast %13 : vector<32x1xf32> to vector<32x16xf32>
    %15 = arith.addf %12, %14 : vector<32x16xf32>
    %16 = vector.extract_strided_slice %15 {offsets = [0, 0], sizes = [16, 16], strides = [1, 1]} : vector<32x16xf32> to vector<16x16xf32>
    %17 = vector.extract_strided_slice %15 {offsets = [16, 0], sizes = [16, 16], strides = [1, 1]} : vector<32x16xf32> to vector<16x16xf32>
    %18 = arith.mulf %8, %16 : vector<16x16xf32>
    %19 = arith.addf %18, %17 : vector<16x16xf32>
    %cst_12 = arith.constant 0.000000e+00 : f32
    %20 = vector.broadcast %cst_12 : f32 to vector<16x16xf32>
    %21 = arith.maximumf %19, %20 : vector<16x16xf32>
    %22 = arith.truncf %21 : vector<16x16xf32> to vector<16x16xbf16>
    %c0_13 = arith.constant 0 : index
    %c0_14 = arith.constant 0 : index
    %23 = vector.load %arg7[%c0_13, %c0_14] : memref<64x16xbf16, #tpu.memory_space<vmem>>, vector<64x16xbf16>
    %cst_15 = arith.constant dense<0.000000e+00> : vector<64x16xf32>
    %24 = tpu.matmul %23, %22, %cst_15 {dimension_numbers = #tpu.dot_dimension_numbers<[1], [0], [0], [1], [0, 0, 1, 1], [], []>} : vector<64x16xbf16>, vector<16x16xbf16>, vector<64x16xf32> -> vector<64x16xf32>
    %25 = vector.extract_strided_slice %24 {offsets = [0, 0], sizes = [32, 16], strides = [1, 1]} : vector<64x16xf32> to vector<32x16xf32>
    %26 = arith.truncf %25 : vector<32x16xf32> to vector<32x16xbf16>
    %c0_16 = arith.constant 0 : index
    %c0_17 = arith.constant 0 : index
    %c0_18 = arith.constant 0 : index
    %27 = vector.load %arg8[%c0_16, %c0_17, %c0_18] : memref<1x32x16xbf16, #tpu.memory_space<vmem>>, vector<1x32x16xbf16>
    %28 = vector.shape_cast %27 : vector<1x32x16xbf16> to vector<32x16xbf16>
    %29 = vector.shape_cast %26 : vector<32x16xbf16> to vector<1x32x16xbf16>
    tpu.vector_store %arg8[%c0_16, %c0_17, %c0_18], %29 {strides = array<i32>} : memref<1x32x16xbf16, #tpu.memory_space<vmem>>, vector<1x32x16xbf16>,
    %30 = vector.extract_strided_slice %24 {offsets = [32, 0], sizes = [32, 16], strides = [1, 1]} : vector<64x16xf32> to vector<32x16xf32>
    %31 = arith.truncf %30 : vector<32x16xf32> to vector<32x16xbf16>
    %c0_19 = arith.constant 0 : index
    %c0_20 = arith.constant 0 : index
    %c0_21 = arith.constant 0 : index
    %32 = vector.load %arg9[%c0_19, %c0_20, %c0_21] : memref<1x32x16xbf16, #tpu.memory_space<vmem>>, vector<1x32x16xbf16>
    %33 = vector.shape_cast %32 : vector<1x32x16xbf16> to vector<32x16xbf16>
    %34 = vector.shape_cast %31 : vector<32x16xbf16> to vector<1x32x16xbf16>
    tpu.vector_store %arg9[%c0_19, %c0_20, %c0_21], %34 {strides = array<i32>} : memref<1x32x16xbf16, #tpu.memory_space<vmem>>, vector<1x32x16xbf16>,
    %cst_22 = arith.constant dense<0.000000e+00> : vector<32xf32>
    %35 = vector.multi_reduction <add>, %25, %cst_22 [1] : vector<32x16xf32> to vector<32xf32>
    %36 = vector.shape_cast %35 : vector<32xf32> to vector<32x1xf32>
    %37 = arith.mulf %25, %25 : vector<32x16xf32>
    %cst_23 = arith.constant dense<0.000000e+00> : vector<32xf32>
    %38 = vector.multi_reduction <add>, %37, %cst_23 [1] : vector<32x16xf32> to vector<32xf32>
    %39 = vector.shape_cast %38 : vector<32xf32> to vector<32x1xf32>
    %40 = tpu.concatenate %36, %39 in 1 : vector<32x1xf32>, vector<32x1xf32> -> vector<32x2xf32>
    %41 = tpu.transpose %40, [1, 0] : vector<32x2xf32> -> vector<2x32xf32>
    %c0_24 = arith.constant 0 : index
    %c0_25 = arith.constant 0 : index
    %c0_26 = arith.constant 0 : index
    %c0_27 = arith.constant 0 : index
    %42 = vector.load %arg10[%c0_24, %c0_25, %c0_26, %c0_27] : memref<1x1x2x32xf32, #tpu.memory_space<vmem>>, vector<1x1x2x32xf32>
    %43 = vector.shape_cast %42 : vector<1x1x2x32xf32> to vector<2x32xf32>
    %44 = vector.shape_cast %41 : vector<2x32xf32> to vector<1x1x2x32xf32>
    tpu.vector_store %arg10[%c0_24, %c0_25, %c0_26, %c0_27], %44 {strides = array<i32>} : memref<1x1x2x32xf32, #tpu.memory_space<vmem>>, vector<1x1x2x32xf32>,
    return
  }
  func.func @transform_0(%arg0: i32, %arg1: i32) -> (i32, i32, i32) {
    %c0_i32 = arith.constant 0 : i32
    %c0_i32_0 = arith.constant 0 : i32
    return %arg0, %c0_i32, %arg1 : i32, i32, i32
  }
  func.func @transform_1(%arg0: i32, %arg1: i32) -> (i32, i32) {
    %c0_i32 = arith.constant 0 : i32
    %c0_i32_0 = arith.constant 0 : i32
    %c0_i32_1 = arith.constant 0 : i32
    return %c0_i32, %c0_i32_0 : i32, i32
  }
  func.func @transform_2(%arg0: i32, %arg1: i32) -> (i32, i32, i32) {
    %c0_i32 = arith.constant 0 : i32
    %c0_i32_0 = arith.constant 0 : i32
    return %arg0, %c0_i32, %arg1 : i32, i32, i32
  }
  func.func @transform_3(%arg0: i32, %arg1: i32) -> (i32, i32) {
    %c0_i32 = arith.constant 0 : i32
    %c0_i32_0 = arith.constant 0 : i32
    %c0_i32_1 = arith.constant 0 : i32
    return %c0_i32, %c0_i32_0 : i32, i32
  }
  func.func @transform_4(%arg0: i32, %arg1: i32) -> (i32, i32) {
    %c0_i32 = arith.constant 0 : i32
    %c0_i32_0 = arith.constant 0 : i32
    %c0_i32_1 = arith.constant 0 : i32
    return %c0_i32, %c0_i32_0 : i32, i32
  }
  func.func @transform_5(%arg0: i32, %arg1: i32) -> (i32, i32) {
    %c0_i32 = arith.constant 0 : i32
    %c0_i32_0 = arith.constant 0 : i32
    %c0_i32_1 = arith.constant 0 : i32
    return %c0_i32, %c0_i32_0 : i32, i32
  }
  func.func @transform_6(%arg0: i32, %arg1: i32) -> (i32, i32, i32) {
    %c0_i32 = arith.constant 0 : i32
    %c0_i32_0 = arith.constant 0 : i32
    return %arg0, %c0_i32, %arg1 : i32, i32, i32
  }
  func.func @transform_7(%arg0: i32, %arg1: i32) -> (i32, i32, i32) {
    %c0_i32 = arith.constant 0 : i32
    %c0_i32_0 = arith.constant 0 : i32
    return %arg0, %c0_i32, %arg1 : i32, i32, i32
  }
  func.func @transform_8(%arg0: i32, %arg1: i32) -> (i32, i32, i32, i32) {
    %c0_i32 = arith.constant 0 : i32
    %c0_i32_0 = arith.constant 0 : i32
    %c0_i32_1 = arith.constant 0 : i32
    return %arg0, %arg1, %c0_i32, %c0_i32_0 : i32, i32, i32, i32
  }
}

module attributes {stable_mosaic.version = 11 : i64} {
  func.func @kernel(%arg0: i32, %arg1: i32, %arg2: memref<1x32x16xbf16, #tpu.memory_space<vmem>>, %arg3: memref<32x2xf32, #tpu.memory_space<vmem>>, %arg4: memref<1x8x16xbf16, #tpu.memory_space<vmem>>, %arg5: memref<1x32x16xbf16, #tpu.memory_space<vmem>>, %arg6: memref<64x8xbf16, #tpu.memory_space<vmem>>, %arg7: memref<64x1xf32, #tpu.memory_space<vmem>>, %arg8: memref<32x32xbf16, #tpu.memory_space<vmem>>, %arg9: memref<1x32x16xbf16, #tpu.memory_space<vmem>>, %arg10: memref<1x1x2x32xf32, #tpu.memory_space<vmem>>) attributes {dimension_semantics = [#tpu.dimension_semantics<parallel>, #tpu.dimension_semantics<parallel>], iteration_bounds = array<i64: 2, 1>, scalar_prefetch = 0 : i64, scratch_operands = 0 : i64, tpu.core_type = #tpu.core_type<tc>, window_params = [{transform_indices = @transform_0, window_bounds = array<i64: 1, 32, 16>}, {pipeline_mode = #tpu.pipeline_mode<synchronous>, transform_indices = @transform_1, window_bounds = array<i64: 32, 2>}, {transform_indices = @transform_2, window_bounds = array<i64: 1, 8, 16>}, {transform_indices = @transform_3, window_bounds = array<i64: 1, 32, 16>}, {pipeline_mode = #tpu.pipeline_mode<synchronous>, transform_indices = @transform_4, window_bounds = array<i64: 64, 8>}, {pipeline_mode = #tpu.pipeline_mode<synchronous>, transform_indices = @transform_5, window_bounds = array<i64: 64, 1>}, {pipeline_mode = #tpu.pipeline_mode<synchronous>, transform_indices = @transform_6, window_bounds = array<i64: 32, 32>}, {transform_indices = @transform_7, window_bounds = array<i64: 1, 32, 16>}, {transform_indices = @transform_8, window_bounds = array<i64: 1, 1, 2, 32>}]} {
    %c0 = arith.constant 0 : index
    %c0_0 = arith.constant 0 : index
    %c0_1 = arith.constant 0 : index
    %0 = vector.load %arg2[%c0, %c0_0, %c0_1] : memref<1x32x16xbf16, #tpu.memory_space<vmem>>, vector<1x32x16xbf16>
    %1 = vector.shape_cast %0 : vector<1x32x16xbf16> to vector<32x16xbf16>
    %2 = arith.extf %1 : vector<32x16xbf16> to vector<32x16xf32>
    %c0_2 = arith.constant 0 : index
    %c0_3 = arith.constant 0 : index
    %3 = vector.load %arg3[%c0_2, %c0_3] : memref<32x2xf32, #tpu.memory_space<vmem>>, vector<32x1xf32>
    %c0_4 = arith.constant 0 : index
    %c1 = arith.constant 1 : index
    %4 = vector.load %arg3[%c0_4, %c1] : memref<32x2xf32, #tpu.memory_space<vmem>>, vector<32x1xf32>
    %5 = vector.broadcast %3 : vector<32x1xf32> to vector<32x16xf32>
    %6 = arith.subf %2, %5 : vector<32x16xf32>
    %7 = vector.broadcast %4 : vector<32x1xf32> to vector<32x16xf32>
    %8 = arith.mulf %6, %7 : vector<32x16xf32>
    %c0_5 = arith.constant 0 : index
    %c0_6 = arith.constant 0 : index
    %9 = vector.load %arg6[%c0_5, %c0_6] : memref<64x8xbf16, #tpu.memory_space<vmem>>, vector<64x8xbf16>
    %c0_7 = arith.constant 0 : index
    %c0_8 = arith.constant 0 : index
    %c0_9 = arith.constant 0 : index
    %10 = vector.load %arg4[%c0_7, %c0_8, %c0_9] : memref<1x8x16xbf16, #tpu.memory_space<vmem>>, vector<1x8x16xbf16>
    %11 = vector.shape_cast %10 : vector<1x8x16xbf16> to vector<8x16xbf16>
    %cst = arith.constant dense<0.000000e+00> : vector<64x16xf32>
    %12 = tpu.matmul %9, %11, %cst {dimension_numbers = #tpu.dot_dimension_numbers<[1], [0], [0], [1], [0, 0, 1, 1], [], []>} : vector<64x8xbf16>, vector<8x16xbf16>, vector<64x16xf32> -> vector<64x16xf32>
    %c0_10 = arith.constant 0 : index
    %c0_11 = arith.constant 0 : index
    %13 = vector.load %arg7[%c0_10, %c0_11] : memref<64x1xf32, #tpu.memory_space<vmem>>, vector<64x1xf32>
    %14 = vector.broadcast %13 : vector<64x1xf32> to vector<64x16xf32>
    %15 = arith.addf %12, %14 : vector<64x16xf32>
    %16 = vector.extract_strided_slice %15 {offsets = [0, 0], sizes = [32, 16], strides = [1, 1]} : vector<64x16xf32> to vector<32x16xf32>
    %17 = vector.extract_strided_slice %15 {offsets = [32, 0], sizes = [32, 16], strides = [1, 1]} : vector<64x16xf32> to vector<32x16xf32>
    %18 = arith.mulf %8, %16 : vector<32x16xf32>
    %19 = arith.addf %18, %17 : vector<32x16xf32>
    %cst_12 = arith.constant 0.000000e+00 : f32
    %20 = vector.broadcast %cst_12 : f32 to vector<32x16xf32>
    %21 = arith.maximumf %19, %20 : vector<32x16xf32>
    %22 = arith.truncf %21 : vector<32x16xf32> to vector<32x16xbf16>
    %c0_13 = arith.constant 0 : index
    %c0_14 = arith.constant 0 : index
    %23 = vector.load %arg8[%c0_13, %c0_14] : memref<32x32xbf16, #tpu.memory_space<vmem>>, vector<32x32xbf16>
    %cst_15 = arith.constant dense<0.000000e+00> : vector<32x16xf32>
    %24 = tpu.matmul %23, %22, %cst_15 {dimension_numbers = #tpu.dot_dimension_numbers<[1], [0], [0], [1], [0, 0, 1, 1], [], []>} : vector<32x32xbf16>, vector<32x16xbf16>, vector<32x16xf32> -> vector<32x16xf32>
    %c0_16 = arith.constant 0 : index
    %c0_17 = arith.constant 0 : index
    %c0_18 = arith.constant 0 : index
    %25 = vector.load %arg5[%c0_16, %c0_17, %c0_18] : memref<1x32x16xbf16, #tpu.memory_space<vmem>>, vector<1x32x16xbf16>
    %26 = vector.shape_cast %25 : vector<1x32x16xbf16> to vector<32x16xbf16>
    %27 = arith.extf %26 : vector<32x16xbf16> to vector<32x16xf32>
    %28 = arith.addf %24, %27 : vector<32x16xf32>
    %29 = arith.truncf %28 : vector<32x16xf32> to vector<32x16xbf16>
    %c0_19 = arith.constant 0 : index
    %c0_20 = arith.constant 0 : index
    %c0_21 = arith.constant 0 : index
    %30 = vector.load %arg9[%c0_19, %c0_20, %c0_21] : memref<1x32x16xbf16, #tpu.memory_space<vmem>>, vector<1x32x16xbf16>
    %31 = vector.shape_cast %30 : vector<1x32x16xbf16> to vector<32x16xbf16>
    %32 = vector.shape_cast %29 : vector<32x16xbf16> to vector<1x32x16xbf16>
    tpu.vector_store %arg9[%c0_19, %c0_20, %c0_21], %32 {strides = array<i32>} : memref<1x32x16xbf16, #tpu.memory_space<vmem>>, vector<1x32x16xbf16>,
    %cst_22 = arith.constant dense<0.000000e+00> : vector<32xf32>
    %33 = vector.multi_reduction <add>, %28, %cst_22 [1] : vector<32x16xf32> to vector<32xf32>
    %34 = vector.shape_cast %33 : vector<32xf32> to vector<32x1xf32>
    %35 = arith.mulf %28, %28 : vector<32x16xf32>
    %cst_23 = arith.constant dense<0.000000e+00> : vector<32xf32>
    %36 = vector.multi_reduction <add>, %35, %cst_23 [1] : vector<32x16xf32> to vector<32xf32>
    %37 = vector.shape_cast %36 : vector<32xf32> to vector<32x1xf32>
    %38 = tpu.concatenate %34, %37 in 1 : vector<32x1xf32>, vector<32x1xf32> -> vector<32x2xf32>
    %39 = tpu.transpose %38, [1, 0] : vector<32x2xf32> -> vector<2x32xf32>
    %c0_24 = arith.constant 0 : index
    %c0_25 = arith.constant 0 : index
    %c0_26 = arith.constant 0 : index
    %c0_27 = arith.constant 0 : index
    %40 = vector.load %arg10[%c0_24, %c0_25, %c0_26, %c0_27] : memref<1x1x2x32xf32, #tpu.memory_space<vmem>>, vector<1x1x2x32xf32>
    %41 = vector.shape_cast %40 : vector<1x1x2x32xf32> to vector<2x32xf32>
    %42 = vector.shape_cast %39 : vector<2x32xf32> to vector<1x1x2x32xf32>
    tpu.vector_store %arg10[%c0_24, %c0_25, %c0_26, %c0_27], %42 {strides = array<i32>} : memref<1x1x2x32xf32, #tpu.memory_space<vmem>>, vector<1x1x2x32xf32>,
    return
  }
  func.func @transform_0(%arg0: i32, %arg1: i32) -> (i32, i32, i32) {
    %c0_i32 = arith.constant 0 : i32
    %c0_i32_0 = arith.constant 0 : i32
    return %arg0, %c0_i32, %arg1 : i32, i32, i32
  }
  func.func @transform_1(%arg0: i32, %arg1: i32) -> (i32, i32) {
    %c0_i32 = arith.constant 0 : i32
    %c0_i32_0 = arith.constant 0 : i32
    %c0_i32_1 = arith.constant 0 : i32
    return %c0_i32, %c0_i32_0 : i32, i32
  }
  func.func @transform_2(%arg0: i32, %arg1: i32) -> (i32, i32, i32) {
    %c0_i32 = arith.constant 0 : i32
    %c0_i32_0 = arith.constant 0 : i32
    return %arg0, %c0_i32, %arg1 : i32, i32, i32
  }
  func.func @transform_3(%arg0: i32, %arg1: i32) -> (i32, i32, i32) {
    %c0_i32 = arith.constant 0 : i32
    %c0_i32_0 = arith.constant 0 : i32
    return %arg0, %c0_i32, %arg1 : i32, i32, i32
  }
  func.func @transform_4(%arg0: i32, %arg1: i32) -> (i32, i32) {
    %c0_i32 = arith.constant 0 : i32
    %c0_i32_0 = arith.constant 0 : i32
    %c0_i32_1 = arith.constant 0 : i32
    return %c0_i32, %c0_i32_0 : i32, i32
  }
  func.func @transform_5(%arg0: i32, %arg1: i32) -> (i32, i32) {
    %c0_i32 = arith.constant 0 : i32
    %c0_i32_0 = arith.constant 0 : i32
    %c0_i32_1 = arith.constant 0 : i32
    return %c0_i32, %c0_i32_0 : i32, i32
  }
  func.func @transform_6(%arg0: i32, %arg1: i32) -> (i32, i32) {
    %c0_i32 = arith.constant 0 : i32
    %c0_i32_0 = arith.constant 0 : i32
    %c0_i32_1 = arith.constant 0 : i32
    return %c0_i32, %c0_i32_0 : i32, i32
  }
  func.func @transform_7(%arg0: i32, %arg1: i32) -> (i32, i32, i32) {
    %c0_i32 = arith.constant 0 : i32
    %c0_i32_0 = arith.constant 0 : i32
    return %arg0, %c0_i32, %arg1 : i32, i32, i32
  }
  func.func @transform_8(%arg0: i32, %arg1: i32) -> (i32, i32, i32, i32) {
    %c0_i32 = arith.constant 0 : i32
    %c0_i32_0 = arith.constant 0 : i32
    %c0_i32_1 = arith.constant 0 : i32
    return %arg0, %arg1, %c0_i32, %c0_i32_0 : i32, i32, i32, i32
  }
}

module attributes {stable_mosaic.version = 11 : i64} {
  func.func @kernel(%arg0: i32, %arg1: i32, %arg2: memref<1x32x16xbf16, #tpu.memory_space<vmem>>, %arg3: memref<32x2xf32, #tpu.memory_space<vmem>>, %arg4: memref<1x8x16xbf16, #tpu.memory_space<vmem>>, %arg5: memref<64x8xbf16, #tpu.memory_space<vmem>>, %arg6: memref<64x1xf32, #tpu.memory_space<vmem>>, %arg7: memref<32x32xbf16, #tpu.memory_space<vmem>>, %arg8: memref<1x32x16xbf16, #tpu.memory_space<vmem>>, %arg9: memref<1x1x2x32xf32, #tpu.memory_space<vmem>>) attributes {dimension_semantics = [#tpu.dimension_semantics<parallel>, #tpu.dimension_semantics<parallel>], iteration_bounds = array<i64: 2, 1>, scalar_prefetch = 0 : i64, scratch_operands = 0 : i64, tpu.core_type = #tpu.core_type<tc>, window_params = [{transform_indices = @transform_0, window_bounds = array<i64: 1, 32, 16>}, {pipeline_mode = #tpu.pipeline_mode<synchronous>, transform_indices = @transform_1, window_bounds = array<i64: 32, 2>}, {transform_indices = @transform_2, window_bounds = array<i64: 1, 8, 16>}, {pipeline_mode = #tpu.pipeline_mode<synchronous>, transform_indices = @transform_3, window_bounds = array<i64: 64, 8>}, {pipeline_mode = #tpu.pipeline_mode<synchronous>, transform_indices = @transform_4, window_bounds = array<i64: 64, 1>}, {pipeline_mode = #tpu.pipeline_mode<synchronous>, transform_indices = @transform_5, window_bounds = array<i64: 32, 32>}, {transform_indices = @transform_6, window_bounds = array<i64: 1, 32, 16>}, {transform_indices = @transform_7, window_bounds = array<i64: 1, 1, 2, 32>}]} {
    %c0 = arith.constant 0 : index
    %c0_0 = arith.constant 0 : index
    %c0_1 = arith.constant 0 : index
    %0 = vector.load %arg2[%c0, %c0_0, %c0_1] : memref<1x32x16xbf16, #tpu.memory_space<vmem>>, vector<1x32x16xbf16>
    %1 = vector.shape_cast %0 : vector<1x32x16xbf16> to vector<32x16xbf16>
    %2 = arith.extf %1 : vector<32x16xbf16> to vector<32x16xf32>
    %c0_2 = arith.constant 0 : index
    %c0_3 = arith.constant 0 : index
    %3 = vector.load %arg3[%c0_2, %c0_3] : memref<32x2xf32, #tpu.memory_space<vmem>>, vector<32x1xf32>
    %c0_4 = arith.constant 0 : index
    %c1 = arith.constant 1 : index
    %4 = vector.load %arg3[%c0_4, %c1] : memref<32x2xf32, #tpu.memory_space<vmem>>, vector<32x1xf32>
    %5 = vector.broadcast %3 : vector<32x1xf32> to vector<32x16xf32>
    %6 = arith.subf %2, %5 : vector<32x16xf32>
    %7 = vector.broadcast %4 : vector<32x1xf32> to vector<32x16xf32>
    %8 = arith.mulf %6, %7 : vector<32x16xf32>
    %c0_5 = arith.constant 0 : index
    %c0_6 = arith.constant 0 : index
    %9 = vector.load %arg5[%c0_5, %c0_6] : memref<64x8xbf16, #tpu.memory_space<vmem>>, vector<64x8xbf16>
    %c0_7 = arith.constant 0 : index
    %c0_8 = arith.constant 0 : index
    %c0_9 = arith.constant 0 : index
    %10 = vector.load %arg4[%c0_7, %c0_8, %c0_9] : memref<1x8x16xbf16, #tpu.memory_space<vmem>>, vector<1x8x16xbf16>
    %11 = vector.shape_cast %10 : vector<1x8x16xbf16> to vector<8x16xbf16>
    %cst = arith.constant dense<0.000000e+00> : vector<64x16xf32>
    %12 = tpu.matmul %9, %11, %cst {dimension_numbers = #tpu.dot_dimension_numbers<[1], [0], [0], [1], [0, 0, 1, 1], [], []>} : vector<64x8xbf16>, vector<8x16xbf16>, vector<64x16xf32> -> vector<64x16xf32>
    %c0_10 = arith.constant 0 : index
    %c0_11 = arith.constant 0 : index
    %13 = vector.load %arg6[%c0_10, %c0_11] : memref<64x1xf32, #tpu.memory_space<vmem>>, vector<64x1xf32>
    %14 = vector.broadcast %13 : vector<64x1xf32> to vector<64x16xf32>
    %15 = arith.addf %12, %14 : vector<64x16xf32>
    %16 = vector.extract_strided_slice %15 {offsets = [0, 0], sizes = [32, 16], strides = [1, 1]} : vector<64x16xf32> to vector<32x16xf32>
    %17 = vector.extract_strided_slice %15 {offsets = [32, 0], sizes = [32, 16], strides = [1, 1]} : vector<64x16xf32> to vector<32x16xf32>
    %18 = arith.mulf %8, %16 : vector<32x16xf32>
    %19 = arith.addf %18, %17 : vector<32x16xf32>
    %cst_12 = arith.constant 0.000000e+00 : f32
    %20 = vector.broadcast %cst_12 : f32 to vector<32x16xf32>
    %21 = arith.maximumf %19, %20 : vector<32x16xf32>
    %22 = arith.truncf %21 : vector<32x16xf32> to vector<32x16xbf16>
    %c0_13 = arith.constant 0 : index
    %c0_14 = arith.constant 0 : index
    %23 = vector.load %arg7[%c0_13, %c0_14] : memref<32x32xbf16, #tpu.memory_space<vmem>>, vector<32x32xbf16>
    %cst_15 = arith.constant dense<0.000000e+00> : vector<32x16xf32>
    %24 = tpu.matmul %23, %22, %cst_15 {dimension_numbers = #tpu.dot_dimension_numbers<[1], [0], [0], [1], [0, 0, 1, 1], [], []>} : vector<32x32xbf16>, vector<32x16xbf16>, vector<32x16xf32> -> vector<32x16xf32>
    %25 = arith.truncf %24 : vector<32x16xf32> to vector<32x16xbf16>
    %c0_16 = arith.constant 0 : index
    %c0_17 = arith.constant 0 : index
    %c0_18 = arith.constant 0 : index
    %26 = vector.load %arg8[%c0_16, %c0_17, %c0_18] : memref<1x32x16xbf16, #tpu.memory_space<vmem>>, vector<1x32x16xbf16>
    %27 = vector.shape_cast %26 : vector<1x32x16xbf16> to vector<32x16xbf16>
    %28 = vector.shape_cast %25 : vector<32x16xbf16> to vector<1x32x16xbf16>
    tpu.vector_store %arg8[%c0_16, %c0_17, %c0_18], %28 {strides = array<i32>} : memref<1x32x16xbf16, #tpu.memory_space<vmem>>, vector<1x32x16xbf16>,
    %cst_19 = arith.constant dense<0.000000e+00> : vector<32xf32>
    %29 = vector.multi_reduction <add>, %24, %cst_19 [1] : vector<32x16xf32> to vector<32xf32>
    %30 = vector.shape_cast %29 : vector<32xf32> to vector<32x1xf32>
    %31 = arith.mulf %24, %24 : vector<32x16xf32>
    %cst_20 = arith.constant dense<0.000000e+00> : vector<32xf32>
    %32 = vector.multi_reduction <add>, %31, %cst_20 [1] : vector<32x16xf32> to vector<32xf32>
    %33 = vector.shape_cast %32 : vector<32xf32> to vector<32x1xf32>
    %34 = tpu.concatenate %30, %33 in 1 : vector<32x1xf32>, vector<32x1xf32> -> vector<32x2xf32>
    %35 = tpu.transpose %34, [1, 0] : vector<32x2xf32> -> vector<2x32xf32>
    %c0_21 = arith.constant 0 : index
    %c0_22 = arith.constant 0 : index
    %c0_23 = arith.constant 0 : index
    %c0_24 = arith.constant 0 : index
    %36 = vector.load %arg9[%c0_21, %c0_22, %c0_23, %c0_24] : memref<1x1x2x32xf32, #tpu.memory_space<vmem>>, vector<1x1x2x32xf32>
    %37 = vector.shape_cast %36 : vector<1x1x2x32xf32> to vector<2x32xf32>
    %38 = vector.shape_cast %35 : vector<2x32xf32> to vector<1x1x2x32xf32>
    tpu.vector_store %arg9[%c0_21, %c0_22, %c0_23, %c0_24], %38 {strides = array<i32>} : memref<1x1x2x32xf32, #tpu.memory_space<vmem>>, vector<1x1x2x32xf32>,
    return
  }
  func.func @transform_0(%arg0: i32, %arg1: i32) -> (i32, i32, i32) {
    %c0_i32 = arith.constant 0 : i32
    %c0_i32_0 = arith.constant 0 : i32
    return %arg0, %c0_i32, %arg1 : i32, i32, i32
  }
  func.func @transform_1(%arg0: i32, %arg1: i32) -> (i32, i32) {
    %c0_i32 = arith.constant 0 : i32
    %c0_i32_0 = arith.constant 0 : i32
    %c0_i32_1 = arith.constant 0 : i32
    return %c0_i32, %c0_i32_0 : i32, i32
  }
  func.func @transform_2(%arg0: i32, %arg1: i32) -> (i32, i32, i32) {
    %c0_i32 = arith.constant 0 : i32
    %c0_i32_0 = arith.constant 0 : i32
    return %arg0, %c0_i32, %arg1 : i32, i32, i32
  }
  func.func @transform_3(%arg0: i32, %arg1: i32) -> (i32, i32) {
    %c0_i32 = arith.constant 0 : i32
    %c0_i32_0 = arith.constant 0 : i32
    %c0_i32_1 = arith.constant 0 : i32
    return %c0_i32, %c0_i32_0 : i32, i32
  }
  func.func @transform_4(%arg0: i32, %arg1: i32) -> (i32, i32) {
    %c0_i32 = arith.constant 0 : i32
    %c0_i32_0 = arith.constant 0 : i32
    %c0_i32_1 = arith.constant 0 : i32
    return %c0_i32, %c0_i32_0 : i32, i32
  }
  func.func @transform_5(%arg0: i32, %arg1: i32) -> (i32, i32) {
    %c0_i32 = arith.constant 0 : i32
    %c0_i32_0 = arith.constant 0 : i32
    %c0_i32_1 = arith.constant 0 : i32
    return %c0_i32, %c0_i32_0 : i32, i32
  }
  func.func @transform_6(%arg0: i32, %arg1: i32) -> (i32, i32, i32) {
    %c0_i32 = arith.constant 0 : i32
    %c0_i32_0 = arith.constant 0 : i32
    return %arg0, %c0_i32, %arg1 : i32, i32, i32
  }
  func.func @transform_7(%arg0: i32, %arg1: i32) -> (i32, i32, i32, i32) {
    %c0_i32 = arith.constant 0 : i32
    %c0_i32_0 = arith.constant 0 : i32
    %c0_i32_1 = arith.constant 0 : i32
    return %arg0, %arg1, %c0_i32, %c0_i32_0 : i32, i32, i32, i32
  }
}

module attributes {stable_mosaic.version = 11 : i64} {
  func.func @kernel(%arg0: i32, %arg1: i32, %arg2: memref<1x32x16xbf16, #tpu.memory_space<vmem>>, %arg3: memref<32x2xf32, #tpu.memory_space<vmem>>, %arg4: memref<1x8x16xbf16, #tpu.memory_space<vmem>>, %arg5: memref<64x8xbf16, #tpu.memory_space<vmem>>, %arg6: memref<64x1xf32, #tpu.memory_space<vmem>>, %arg7: memref<4x32xbf16, #tpu.memory_space<vmem>>, %arg8: memref<4x1xf32, #tpu.memory_space<vmem>>, %arg9: memref<1x4x16xf32, #tpu.memory_space<vmem>>) attributes {dimension_semantics = [#tpu.dimension_semantics<parallel>, #tpu.dimension_semantics<parallel>], iteration_bounds = array<i64: 2, 1>, scalar_prefetch = 0 : i64, scratch_operands = 0 : i64, tpu.core_type = #tpu.core_type<tc>, window_params = [{transform_indices = @transform_0, window_bounds = array<i64: 1, 32, 16>}, {pipeline_mode = #tpu.pipeline_mode<synchronous>, transform_indices = @transform_1, window_bounds = array<i64: 32, 2>}, {transform_indices = @transform_2, window_bounds = array<i64: 1, 8, 16>}, {pipeline_mode = #tpu.pipeline_mode<synchronous>, transform_indices = @transform_3, window_bounds = array<i64: 64, 8>}, {pipeline_mode = #tpu.pipeline_mode<synchronous>, transform_indices = @transform_4, window_bounds = array<i64: 64, 1>}, {pipeline_mode = #tpu.pipeline_mode<synchronous>, transform_indices = @transform_5, window_bounds = array<i64: 4, 32>}, {pipeline_mode = #tpu.pipeline_mode<synchronous>, transform_indices = @transform_6, window_bounds = array<i64: 4, 1>}, {transform_indices = @transform_7, window_bounds = array<i64: 1, 4, 16>}]} {
    %c0 = arith.constant 0 : index
    %c0_0 = arith.constant 0 : index
    %c0_1 = arith.constant 0 : index
    %0 = vector.load %arg2[%c0, %c0_0, %c0_1] : memref<1x32x16xbf16, #tpu.memory_space<vmem>>, vector<1x32x16xbf16>
    %1 = vector.shape_cast %0 : vector<1x32x16xbf16> to vector<32x16xbf16>
    %2 = arith.extf %1 : vector<32x16xbf16> to vector<32x16xf32>
    %c0_2 = arith.constant 0 : index
    %c0_3 = arith.constant 0 : index
    %3 = vector.load %arg3[%c0_2, %c0_3] : memref<32x2xf32, #tpu.memory_space<vmem>>, vector<32x1xf32>
    %c0_4 = arith.constant 0 : index
    %c1 = arith.constant 1 : index
    %4 = vector.load %arg3[%c0_4, %c1] : memref<32x2xf32, #tpu.memory_space<vmem>>, vector<32x1xf32>
    %5 = vector.broadcast %3 : vector<32x1xf32> to vector<32x16xf32>
    %6 = arith.subf %2, %5 : vector<32x16xf32>
    %7 = vector.broadcast %4 : vector<32x1xf32> to vector<32x16xf32>
    %8 = arith.mulf %6, %7 : vector<32x16xf32>
    %c0_5 = arith.constant 0 : index
    %c0_6 = arith.constant 0 : index
    %9 = vector.load %arg5[%c0_5, %c0_6] : memref<64x8xbf16, #tpu.memory_space<vmem>>, vector<64x8xbf16>
    %c0_7 = arith.constant 0 : index
    %c0_8 = arith.constant 0 : index
    %c0_9 = arith.constant 0 : index
    %10 = vector.load %arg4[%c0_7, %c0_8, %c0_9] : memref<1x8x16xbf16, #tpu.memory_space<vmem>>, vector<1x8x16xbf16>
    %11 = vector.shape_cast %10 : vector<1x8x16xbf16> to vector<8x16xbf16>
    %cst = arith.constant dense<0.000000e+00> : vector<64x16xf32>
    %12 = tpu.matmul %9, %11, %cst {dimension_numbers = #tpu.dot_dimension_numbers<[1], [0], [0], [1], [0, 0, 1, 1], [], []>} : vector<64x8xbf16>, vector<8x16xbf16>, vector<64x16xf32> -> vector<64x16xf32>
    %c0_10 = arith.constant 0 : index
    %c0_11 = arith.constant 0 : index
    %13 = vector.load %arg6[%c0_10, %c0_11] : memref<64x1xf32, #tpu.memory_space<vmem>>, vector<64x1xf32>
    %14 = vector.broadcast %13 : vector<64x1xf32> to vector<64x16xf32>
    %15 = arith.addf %12, %14 : vector<64x16xf32>
    %16 = vector.extract_strided_slice %15 {offsets = [0, 0], sizes = [32, 16], strides = [1, 1]} : vector<64x16xf32> to vector<32x16xf32>
    %17 = vector.extract_strided_slice %15 {offsets = [32, 0], sizes = [32, 16], strides = [1, 1]} : vector<64x16xf32> to vector<32x16xf32>
    %18 = arith.mulf %8, %16 : vector<32x16xf32>
    %19 = arith.addf %18, %17 : vector<32x16xf32>
    %cst_12 = arith.constant 0.000000e+00 : f32
    %20 = vector.broadcast %cst_12 : f32 to vector<32x16xf32>
    %21 = arith.maximumf %19, %20 : vector<32x16xf32>
    %22 = arith.truncf %21 : vector<32x16xf32> to vector<32x16xbf16>
    %c0_13 = arith.constant 0 : index
    %c0_14 = arith.constant 0 : index
    %23 = vector.load %arg7[%c0_13, %c0_14] : memref<4x32xbf16, #tpu.memory_space<vmem>>, vector<4x32xbf16>
    %cst_15 = arith.constant dense<0.000000e+00> : vector<4x16xf32>
    %24 = tpu.matmul %23, %22, %cst_15 {dimension_numbers = #tpu.dot_dimension_numbers<[1], [0], [0], [1], [0, 0, 1, 1], [], []>} : vector<4x32xbf16>, vector<32x16xbf16>, vector<4x16xf32> -> vector<4x16xf32>
    %c0_16 = arith.constant 0 : index
    %c0_17 = arith.constant 0 : index
    %25 = vector.load %arg8[%c0_16, %c0_17] : memref<4x1xf32, #tpu.memory_space<vmem>>, vector<4x1xf32>
    %26 = vector.broadcast %25 : vector<4x1xf32> to vector<4x16xf32>
    %27 = arith.addf %24, %26 : vector<4x16xf32>
    %c0_18 = arith.constant 0 : index
    %c0_19 = arith.constant 0 : index
    %c0_20 = arith.constant 0 : index
    %28 = vector.load %arg9[%c0_18, %c0_19, %c0_20] : memref<1x4x16xf32, #tpu.memory_space<vmem>>, vector<1x4x16xf32>
    %29 = vector.shape_cast %28 : vector<1x4x16xf32> to vector<4x16xf32>
    %30 = vector.shape_cast %27 : vector<4x16xf32> to vector<1x4x16xf32>
    tpu.vector_store %arg9[%c0_18, %c0_19, %c0_20], %30 {strides = array<i32>} : memref<1x4x16xf32, #tpu.memory_space<vmem>>, vector<1x4x16xf32>,
    return
  }
  func.func @transform_0(%arg0: i32, %arg1: i32) -> (i32, i32, i32) {
    %c0_i32 = arith.constant 0 : i32
    %c0_i32_0 = arith.constant 0 : i32
    return %arg0, %c0_i32, %arg1 : i32, i32, i32
  }
  func.func @transform_1(%arg0: i32, %arg1: i32) -> (i32, i32) {
    %c0_i32 = arith.constant 0 : i32
    %c0_i32_0 = arith.constant 0 : i32
    %c0_i32_1 = arith.constant 0 : i32
    return %c0_i32, %c0_i32_0 : i32, i32
  }
  func.func @transform_2(%arg0: i32, %arg1: i32) -> (i32, i32, i32) {
    %c0_i32 = arith.constant 0 : i32
    %c0_i32_0 = arith.constant 0 : i32
    return %arg0, %c0_i32, %arg1 : i32, i32, i32
  }
  func.func @transform_3(%arg0: i32, %arg1: i32) -> (i32, i32) {
    %c0_i32 = arith.constant 0 : i32
    %c0_i32_0 = arith.constant 0 : i32
    %c0_i32_1 = arith.constant 0 : i32
    return %c0_i32, %c0_i32_0 : i32, i32
  }
  func.func @transform_4(%arg0: i32, %arg1: i32) -> (i32, i32) {
    %c0_i32 = arith.constant 0 : i32
    %c0_i32_0 = arith.constant 0 : i32
    %c0_i32_1 = arith.constant 0 : i32
    return %c0_i32, %c0_i32_0 : i32, i32
  }
  func.func @transform_5(%arg0: i32, %arg1: i32) -> (i32, i32) {
    %c0_i32 = arith.constant 0 : i32
    %c0_i32_0 = arith.constant 0 : i32
    %c0_i32_1 = arith.constant 0 : i32
    return %c0_i32, %c0_i32_0 : i32, i32
  }
  func.func @transform_6(%arg0: i32, %arg1: i32) -> (i32, i32) {
    %c0_i32 = arith.constant 0 : i32
    %c0_i32_0 = arith.constant 0 : i32
    %c0_i32_1 = arith.constant 0 : i32
    return %c0_i32, %c0_i32_0 : i32, i32
  }
  func.func @transform_7(%arg0: i32, %arg1: i32) -> (i32, i32, i32) {
    %c0_i32 = arith.constant 0 : i32
    %c0_i32_0 = arith.constant 0 : i32
    return %arg0, %c0_i32, %arg1 : i32, i32, i32
  }
}

</mosaic_0001>

<bundles_post_ra>
// kernel: conditional_residual_decoder.6
= control target key start
LH: loop header
LB: loop body
LE: loop exit
PB: predicated region body
PF: predicated region fallthrough
CT: control target
= control target key end

     0   :  { %s606_s15 = smov 0   ;;  %s608_s16 = smov 0   ;;  %s665_s0 = inlined_call_operand.vmem [shape: bf16[2,4,16], index: 0, kind: input, shape index: {}]   ;;  %s666_s1 = inlined_call_operand.vmem [shape: bf16[16,4], index: 1, kind: input, shape index: {}]   ;;  %s667_s2 = inlined_call_operand.vmem [shape: f32[16,1], index: 2, kind: input, shape index: {}]   ;;  %s668_s3 = inlined_call_operand.vmem [shape: bf16[2,16,16], index: 3, kind: output, shape index: {0}]   ;;  %s669_s4 = inlined_call_operand.vmem [shape: f32[2,1,2,16], index: 4, kind: output, shape index: {1}]  }
   0x1   :  { %s610_s17 = smov 0  }
   0x2 LB: > { %s27_s18 = sadd.s32 1, %s572_s16  ;;  %p503_p0 = scmp.ge.s32.totalorder %s576_s17, 1  ;;  %s576_s17 = sphi %s610_s17, %s15_s17   ;;  %s572_s16 = sphi %s608_s16, %s671_s16   ;;  %s568_s15 = sphi %s606_s15, %s670_s15  }
   0x3   : > { %p29_p1 = scmp.ge.s32.totalorder %s27_s18, 2  ;;  %p185_p2 = scmp.lt.s32.totalorder %s576_s17, 3 }
   0x5   : > { %s673_s18 = smov (%p29_p1, %s27_s18), 0  ;;  %p186_p3 = pnand %p503_p0, %p185_p2 }
   0x6   : > { %p223_p4 = scmp.lt.s32.totalorder (!%p186_p3), %s568_s15, 1 }
   0x7   : > { %189 = sbr.rel (%p186_p3) target bundleno = 485 (0x1e5), region = 32 }
   0xc   : > { %v578_v0 = vmov 0.0   ;;  %vm579_vm0 = vmmov 0   ;;  %v249_v1 = vld [vmem:[%s667_s2] sm:$0xff]  ;;  %s675_s15 = smov (!%p223_p4, %s568_s15), 1  ;;  %v580_v2 = vmov 0   ;;  %vm270_vm1 = vcmask 1041408  }
   0xd   : > { %519 = vmatprep.subr.bf16.mxu0 %v578_v0  ;;  %521 = vmatprep.mubr.msk.bf16.mxu0 %vm579_vm0, %v578_v0  ;;  %s504_s21 = sshll.u32 %s675_s15, 1  ;;  %v250_v3 = vld [vmem:[%s667_s2 + $0x8] sm:$0xff]  ;;  %v553_v6 = vld [vmem:[%s666_s1] sm:$0xff]   ;;  %vm266_vm2 = vcmask 31744   ;;  %s514_s29 = sshll.u32 %s675_s15, 3  ;;  %vm326_vm3 = vcmask 130048  }
   0xe   : > { %552 = vset.pattern.permute.xlu0 %v580_v2  ;;  %s229_s26 = scalar_lea.vmem %s665_s0, %s504_s21  ;;  %s237_s6 = scalar_lea.vmem %s668_s3, %s514_s29  ;;  %vm323_vm4 = vcmask 125952   ;;  %vm341_vm5 = vcmask 7168   ;;  %vm376_vm6 = vcmask 123904  }
   0xf   : > { %253 = vperm.xlu0 %552, %v249_v1   ;;  %v248_v4 = vld [vmem:[%s229_s26] sm:$0x3]  ;;  %s244_s9 = scalar_lea.vmem %s669_s4, %s504_s21 }
  0x10   : > { %v272_v5 = vsel %vm270_vm1, %v248_v4, 0 }
  0x11   : > { %520 = vmatpush3.bf16.msra.mxu0 %v272_v5 }
  0x13   : > { %258 = vperm.xlu0 %552, %v250_v3  }
  0x14   : > { %522 = vmatmul.mubr.msk.bf16.vlgmr.msra.gmra.mxu0 %vm266_vm2, %v553_v6 }
  0x8a   : > { %v254_v7 = vpop.permute.xlu0 %253 }
  0x8e   : > { %v259_v14 = vpop.permute.xlu0 %258 }
  0xd4   : > { %v308_v8 = vpop.f32.mrf.mxu0 }
  0xd5   : > { %v309_v9 = vadd.f32 %v308_v8, %v254_v7 }
  0xd6   : > { %v523_v10 = vpop.f32.mrf.mxu0 }
  0xd7   : > { %v515_v11 = vpack.c.bf16 %v309_v9, %v309_v9  ;;  %v327_v12 = vsel %vm326_vm3, %v309_v9, 0.0  ;;  %v333_v13 = vmul.f32 %v309_v9, %v309_v9 }
  0xd8   : > { %328 = vadd.xlane.f32.xlu1 %v327_v12  ;;  %v311_v15 = vpop.f32.mrf.mxu0 }
  0xd9   : > { %324 = vst.msk [vmem:[%s237_s6] sm:$0xf] %vm323_vm4, %v515_v11  ;;  %v312_v16 = vadd.f32 %v311_v15, %v259_v14  ;;  %v335_v19 = vsel %vm326_vm3, %v333_v13, 0.0 }
  0xda   : > { %v524_v17 = vpop.f32.mrf.mxu0 }
  0xdb   : > { %v516_v18 = vpack.c.bf16 %v312_v16, %v312_v16  ;;  %v330_v20 = vsel %vm326_vm3, %v312_v16, 0.0  ;;  %v334_v21 = vmul.f32 %v312_v16, %v312_v16 }
  0xdc   : > { %336 = vadd.xlane.f32.xlu1 %v335_v19  ;;  %331 = vadd.xlane.f32.xlu0 %v330_v20 }
  0xdd   : > { %325 = vst.msk [vmem:[%s237_s6 + $0x4] sm:$0xf] %vm323_vm4, %v516_v18  ;;  %v338_v22 = vsel %vm326_vm3, %v334_v21, 0.0 }
  0xe0   : > { %339 = vadd.xlane.f32.xlu1 %v338_v22 }
 0x161   : > { %v329_v23 = vpop.xlane.xlu1 %328 }
 0x165   : > { %v337_v24 = vpop.xlane.xlu1 %336  ;;  %v332_v26 = vpop.xlane.xlu0 %331 }
 0x166   : > { %v342_v25 = vsel %vm341_vm5, %v329_v23, %v337_v24 }
 0x167   : > { %344 = vxpose.xlu1.b32.start [1/2] (short) (narrow) %v342_v25, 8 }
 0x169   : > { %v340_v27 = vpop.xlane.xlu1 %339 }
 0x16a   : > { %v343_v28 = vsel %vm341_vm5, %v332_v26, %v340_v27 }
 0x16b   : > { %345 = vxpose.xlu1.b32.end [2/2] (short) (narrow) %v343_v28, 8 }
 0x1e3   : > { %v360_v29 = vpop.trf.xlu1 }
 0x1e4   : > { %377 = vst.msk [vmem:[%s244_s9] sm:$0x3] %vm376_vm6, %v360_v29 }
 0x1e5 PF: > { %s15_s17 = sadd.s32 1, %s576_s17   ;;  %s670_s15 = smov %s572_s16 }
 0x1e6   : > { %p12_p5 = scmp.ge.s32.totalorder %s15_s17, 4   ;;  %s671_s16 = smov %s673_s18 }
 0x1e8   :  { %14 = sbr.rel (!%p12_p5) target bundleno = 2 (0x2), region = 74 }

// kernel: conditional_residual_decoder.7
= control target key start
LH: loop header
LB: loop body
LE: loop exit
PB: predicated region body
PF: predicated region fallthrough
CT: control target
= control target key end

     0   :  { %s1121_s27 = smov 0   ;;  %s1123_s28 = smov 0   ;;  %s1231_s0 = inlined_call_operand.vmem [shape: bf16[2,16,16], index: 0, kind: input, shape index: {}]   ;;  %s1232_s1 = inlined_call_operand.vmem [shape: f32[16,2], index: 1, kind: input, shape index: {}]   ;;  %s1233_s2 = inlined_call_operand.vmem [shape: bf16[2,8,16], index: 2, kind: input, shape index: {}]   ;;  %s1234_s3 = inlined_call_operand.vmem [shape: bf16[32,8], index: 3, kind: input, shape index: {}]   ;;  %s1235_s4 = inlined_call_operand.vmem [shape: f32[32,1], index: 4, kind: input, shape index: {}]   ;;  %s1236_s5 = inlined_call_operand.vmem [shape: bf16[64,16], index: 5, kind: input, shape index: {}]   ;;  %s1237_s6 = inlined_call_operand.vmem [shape: bf16[2,32,16], index: 6, kind: output, shape index: {0}]   ;;  %s1238_s7 = inlined_call_operand.vmem [shape: bf16[2,32,16], index: 7, kind: output, shape index: {1}]   ;;  %s1239_s8 = inlined_call_operand.vmem [shape: f32[2,1,2,32], index: 8, kind: output, shape index: {2}]  }
   0x1   :  { %s1125_s29 = smov 0  }
   0x2 LB: > { %s31_s30 = sadd.s32 1, %s1068_s28  ;;  %p943_p0 = scmp.ge.s32.totalorder %s1072_s29, 1  ;;  %s1072_s29 = sphi %s1125_s29, %s19_s29   ;;  %s1068_s28 = sphi %s1123_s28, %s1241_s28   ;;  %s1064_s27 = sphi %s1121_s27, %s1240_s27  }
   0x3   : > { %p33_p1 = scmp.ge.s32.totalorder %s31_s30, 2  ;;  %p304_p2 = scmp.lt.s32.totalorder %s1072_s29, 3 }
   0x5   : > { %s1243_s30 = smov (%p33_p1, %s31_s30), 0  ;;  %p305_p3 = pnand %p943_p0, %p304_p2 }
   0x6   : > { %p366_p4 = scmp.lt.s32.totalorder (!%p305_p3), %s1064_s27, 1 }
   0x7   : > { %308 = sbr.rel (%p305_p3) target bundleno = 702 (0x2be), region = 44 }
   0xc   : > { %v1044_v0 = vld [vmem:[%s1234_s3] sm:$0xff]   ;;  %vm472_vm0 = vcmask 64512   ;;  %s1245_s27 = smov (!%p366_p4, %s1064_s27), 1  ;;  %v1074_v2 = vmov 0   ;;  %vm479_vm1 = vcmask 1043456   ;;  %v410_v3 = vld [vmem:[%s1232_s1 + $0x8] sm:$0xff] }
   0xd   : > { %v409_v1 = vld [vmem:[%s1232_s1] sm:$0xff]  ;;  %999 = vmatprep.mubr.msk.bf16.mxu0 %vm472_vm0, %v1044_v0  ;;  %1041 = vset.pattern.permute.xlu0 %v1074_v2  ;;  %s946_s13 = sshll.u32 %s1245_s27, 2  ;;  %v1075_v4 = vmov 1   ;;  %v1045_v7 = vld [vmem:[%s1234_s3 + $0x8] sm:$0xff]   ;;  %v440_v10 = vld [vmem:[%s1235_s4 + $0x10] sm:$0xff]  ;;  %vm567_vm2 = vcmask 130048  }
   0xe   : > { %413 = vperm.xlu0 %1041, %v409_v1   ;;  %1042 = vset.pattern.permute.xlu1 %v1075_v4  ;;  %s380_s18 = scalar_lea.vmem %s1233_s2, %s946_s13  ;;  %v438_v8 = vld [vmem:[%s1235_s4] sm:$0xff]  ;;  %v439_v9 = vld [vmem:[%s1235_s4 + $0x8] sm:$0xff]  ;;  %v441_v11 = vld [vmem:[%s1235_s4 + $0x18] sm:$0xff]  ;;  %s974_s13 = sshll.u32 %s1245_s27, 3  ;;  %vm661_vm3 = vcmask 125952   ;;  %vm714_vm4 = vcmask 7168  }
   0xf   : > { %424 = vperm.xlu1 %1042, %v409_v1   ;;  %v437_v5 = vld [vmem:[%s380_s18] sm:$0xf]  ;;  %s373_s16 = scalar_lea.vmem %s1231_s0, %s974_s13  ;;  %v1047_v43 = vld [vmem:[%s1236_s5 + $0x8] sm:$0xff]   ;;  %v1048_v44 = vld [vmem:[%s1236_s5 + $0x10] sm:$0xff]   ;;  %s975_s23 = sshll.u32 %s1245_s27, 4  ;;  %vm751_vm5 = vcmask 254976  }
  0x10   : > { %1013 = vmatprep.subr.msk.bf16.mxu0 %vm479_vm1, %v437_v5  ;;  %v481_v6 = vsel %vm479_vm1, %v437_v5, 0  ;;  %v1046_v12 = vld [vmem:[%s1236_s5] sm:$0xff]   ;;  %v1049_v45 = vld [vmem:[%s1236_s5 + $0x18] sm:$0xff]   ;;  %s388_s26 = scalar_lea.vmem %s1237_s6, %s975_s23  ;;  %s396_s11 = scalar_lea.vmem %s1238_s7, %s975_s23 }
  0x11   : > { %998 = vmatpush3.bf16.msra.mxu0 %v481_v6  ;;  %1005 = vmatprep.mubr.msk.bf16.mxu1 %vm567_vm2, %v1046_v12  ;;  %v986_v15 = vld [vmem:[%s373_s16] sm:$0xff]   ;;  %s951_s12 = sshll.u32 %s1245_s27, 1 }
  0x12   : > { %418 = vperm.xlu0 %1041, %v410_v3   ;;  %v987_v18 = vunpack.c.l.bf16 %v986_v15  ;;  %v988_v20 = vunpack.c.h.bf16 %v986_v15  ;;  %s403_s15 = scalar_lea.vmem %s1239_s8, %s951_s12 }
  0x13   : > { %428 = vperm.xlu1 %1042, %v410_v3  }
  0x14   : > { %1000 = vmatmul.mubr.msk.bf16.vlgmr.msra.gmra.mxu0 %vm472_vm0, %v1045_v7 }
  0x16   : > { %444 = vperm.xlu0 %1041, %v438_v8  }
  0x17   : > { %1043 = vset.pattern.permute.xlu1 %v1074_v2 }
  0x18   : > { %449 = vperm.xlu1 %1043, %v439_v9  }
  0x1a   : > { %454 = vperm.xlu0 %1041, %v440_v10  }
  0x1c   : > { %459 = vperm.xlu1 %1043, %v441_v11  }
  0x89   : > { %v414_v13 = vpop.permute.xlu0 %413 }
  0x8a   : > { %v425_v14 = vpop.permute.xlu1 %424  ;;  %v421_v19 = vsub.f32 %v987_v18, %v414_v13 }
  0x8c   : > { %v431_v26 = vmul.f32 %v425_v14, %v421_v19 }
  0x8d   : > { %v419_v16 = vpop.permute.xlu0 %418 }
  0x8e   : > { %v429_v17 = vpop.permute.xlu1 %428  ;;  %v422_v25 = vsub.f32 %v988_v20, %v419_v16 }
  0x90   : > { %v432_v33 = vmul.f32 %v429_v17, %v422_v25 }
  0x91   : > { %v445_v21 = vpop.permute.xlu0 %444 }
  0x93   : > { %v450_v22 = vpop.permute.xlu1 %449 }
  0x95   : > { %v455_v29 = vpop.permute.xlu0 %454 }
  0x97   : > { %v460_v31 = vpop.permute.xlu1 %459 }
  0xd4   : > { %v1001_v23 = vpop.f32.mrf.mxu0 }
  0xd5   : > { %v526_v34 = vadd.f32 %v1001_v23, %v455_v29 }
  0xd6   : > { %v517_v24 = vpop.f32.mrf.mxu0 }
  0xd7   : > { %v518_v27 = vadd.f32 %v517_v24, %v445_v21 }
  0xd8   : > { %v1002_v28 = vpop.f32.mrf.mxu0 }
  0xd9   : > { %v532_v30 = vmul.f32 %v518_v27, %v431_v26  ;;  %v529_v36 = vadd.f32 %v1002_v28, %v460_v31 }
  0xda   : > { %v520_v32 = vpop.f32.mrf.mxu0 }
  0xdb   : > { %v521_v35 = vadd.f32 %v520_v32, %v450_v22  ;;  %v534_v38 = vadd.f32 %v532_v30, %v526_v34 }
  0xdd   : > { %v533_v37 = vmul.f32 %v521_v35, %v432_v33  ;;  %v536_v40 = vmax.f32 %v534_v38, 0.0 }
  0xdf   : > { %v535_v39 = vadd.f32 %v533_v37, %v529_v36 }
  0xe1   : > { %v537_v41 = vmax.f32 %v535_v39, 0.0 }
  0xe3   : > { %v538_v42 = vpack.c.bf16 %v537_v41, %v536_v40 }
  0xe5   : > { %1003 = vmatprep.subr.bf16.mxu1 %v538_v42 }
  0xe6   : > { %1004 = vmatpush3.bf16.msra.mxu1 %v538_v42 }
  0xe9   : > { %1006 = vmatmul.mubr.msk.bf16.vlgmr.msra.gmra.mxu1 %vm567_vm2, %v1047_v43 }
  0xea   : > { %1009 = vmatprep.mubr.msk.bf16.mxu1 %vm567_vm2, %v1048_v44 }
  0xf1   : > { %1010 = vmatmul.mubr.msk.bf16.gmra.mxu1 %vm567_vm2, %v1049_v45 }
 0x1a9   : > { %v1007_v46 = vpop.f32.mrf.mxu1 }
 0x1aa   : > { %v979_v47 = vpack.c.bf16 %v1007_v46, %v1007_v46  ;;  %v700_v52 = vmul.f32 %v1007_v46, %v1007_v46  ;;  %v692_v59 = vsel %vm567_vm2, %v1007_v46, 0.0 }
 0x1ab   : > { %v614_v48 = vpop.f32.mrf.mxu1 }
 0x1ac   : > { %664 = vst.msk [vmem:[%s388_s26 + $0x8] sm:$0xf] %vm661_vm3, %v979_v47  ;;  %v977_v49 = vpack.c.bf16 %v614_v48, %v614_v48  ;;  %v686_v50 = vsel %vm567_vm2, %v614_v48, 0.0  ;;  %v698_v51 = vmul.f32 %v614_v48, %v614_v48  ;;  %v708_v58 = vsel %vm567_vm2, %v700_v52, 0.0 }
 0x1ad   : > { %687 = vadd.xlane.f32.xlu0 %v686_v50  ;;  %v1008_v53 = vpop.f32.mrf.mxu1 }
 0x1ae   : > { %662 = vst.msk [vmem:[%s388_s26] sm:$0xf] %vm661_vm3, %v977_v49  ;;  %v980_v54 = vpack.c.bf16 %v1008_v53, %v1008_v53  ;;  %v702_v55 = vsel %vm567_vm2, %v698_v51, 0.0  ;;  %v695_v62 = vsel %vm567_vm2, %v1008_v53, 0.0  ;;  %v701_v0 = vmul.f32 %v1008_v53, %v1008_v53 }
 0x1af   : > { %703 = vadd.xlane.f32.xlu1 %v702_v55  ;;  %v617_v56 = vpop.f32.mrf.mxu1 }
 0x1b0   : > { %665 = vst.msk [vmem:[%s388_s26 + $0xc] sm:$0xf] %vm661_vm3, %v980_v54  ;;  %v978_v57 = vpack.c.bf16 %v617_v56, %v617_v56  ;;  %v689_v60 = vsel %vm567_vm2, %v617_v56, 0.0  ;;  %v699_v61 = vmul.f32 %v617_v56, %v617_v56  ;;  %v711_v1 = vsel %vm567_vm2, %v701_v0, 0.0 }
 0x1b1   : > { %709 = vadd.xlane.f32.xlu0 %v708_v58  ;;  %v1011_v2 = vpop.f32.mrf.mxu1 }
 0x1b2   : > { %663 = vst.msk [vmem:[%s388_s26 + $0x4] sm:$0xf] %vm661_vm3, %v978_v57  ;;  %v705_v63 = vsel %vm567_vm2, %v699_v61, 0.0  ;;  %v983_v3 = vpack.c.bf16 %v1011_v2, %v1011_v2 }
 0x1b3   : > { %693 = vadd.xlane.f32.xlu1 %v692_v59  ;;  %v630_v4 = vpop.f32.mrf.mxu1 }
 0x1b4   : > { %684 = vst.msk [vmem:[%s396_s11 + $0x8] sm:$0xf] %vm661_vm3, %v983_v3  ;;  %v981_v5 = vpack.c.bf16 %v630_v4, %v630_v4 }
 0x1b5   : > { %690 = vadd.xlane.f32.xlu0 %v689_v60  ;;  %v1012_v6 = vpop.f32.mrf.mxu1 }
 0x1b6   : > { %682 = vst.msk [vmem:[%s396_s11] sm:$0xf] %vm661_vm3, %v981_v5  ;;  %v984_v7 = vpack.c.bf16 %v1012_v6, %v1012_v6 }
 0x1b7   : > { %696 = vadd.xlane.f32.xlu1 %v695_v62  ;;  %v633_v8 = vpop.f32.mrf.mxu1 }
 0x1b8   : > { %685 = vst.msk [vmem:[%s396_s11 + $0xc] sm:$0xf] %vm661_vm3, %v984_v7  ;;  %v982_v9 = vpack.c.bf16 %v633_v8, %v633_v8 }
 0x1b9   : > { %706 = vadd.xlane.f32.xlu0 %v705_v63 }
 0x1ba   : > { %683 = vst.msk [vmem:[%s396_s11 + $0x4] sm:$0xf] %vm661_vm3, %v982_v9 }
 0x1bd   : > { %712 = vadd.xlane.f32.xlu0 %v711_v1 }
 0x236   : > { %v688_v10 = vpop.xlane.xlu0 %687 }
 0x238   : > { %v704_v11 = vpop.xlane.xlu1 %703 }
 0x239   : > { %v715_v12 = vsel %vm714_vm4, %v688_v10, %v704_v11 }
 0x23a   : > { %v710_v13 = vpop.xlane.xlu0 %709  ;;  %719 = vxpose.xlu1.b32.start [1/4] (short) (narrow) %v715_v12, 8 }
 0x23c   : > { %v694_v17 = vpop.xlane.xlu1 %693 }
 0x23d   : > { %v717_v18 = vsel %vm714_vm4, %v694_v17, %v710_v13 }
 0x23e   : > { %v691_v14 = vpop.xlane.xlu0 %690 }
 0x240   : > { %v697_v20 = vpop.xlane.xlu1 %696 }
 0x242   : > { %v707_v15 = vpop.xlane.xlu0 %706 }
 0x243   : > { %v716_v16 = vsel %vm714_vm4, %v691_v14, %v707_v15 }
 0x244   : > { %720 = vxpose.xlu1.b32.cont [2/4] (short) (narrow) %v716_v16, 8 }
 0x246   : > { %v713_v19 = vpop.xlane.xlu0 %712 }
 0x247   : > { %v718_v21 = vsel %vm714_vm4, %v697_v20, %v713_v19 }
 0x248   : > { %721 = vxpose.xlu1.b32.cont [3/4] (short) (narrow) %v717_v18, 8 }
 0x24c   : > { %722 = vxpose.xlu1.b32.end [4/4] (short) (narrow) %v718_v21, 8 }
 0x2bc   : > { %v735_v22 = vpop.trf.xlu1 }
 0x2bd   : > { %752 = vst.msk [vmem:[%s403_s15] sm:$0x3] %vm751_vm5, %v735_v22 }
 0x2be PF: > { %s19_s29 = sadd.s32 1, %s1072_s29   ;;  %s1240_s27 = smov %s1068_s28 }
 0x2bf   : > { %p16_p5 = scmp.ge.s32.totalorder %s19_s29, 4   ;;  %s1241_s28 = smov %s1243_s30 }
 0x2c1   :  { %18 = sbr.rel (!%p16_p5) target bundleno = 2 (0x2), region = 101 }

// kernel: conditional_residual_decoder.9
= control target key start
LH: loop header
LB: loop body
LE: loop exit
PB: predicated region body
PF: predicated region fallthrough
CT: control target
= control target key end

     0   :  { %s1062_s24 = smov 0   ;;  %s1064_s25 = smov 0   ;;  %s1182_s0 = inlined_call_operand.vmem [shape: bf16[2,32,16], index: 0, kind: input, shape index: {}]   ;;  %s1183_s1 = inlined_call_operand.vmem [shape: f32[32,2], index: 1, kind: input, shape index: {}]   ;;  %s1184_s2 = inlined_call_operand.vmem [shape: bf16[2,8,16], index: 2, kind: input, shape index: {}]   ;;  %s1185_s3 = inlined_call_operand.vmem [shape: bf16[64,8], index: 3, kind: input, shape index: {}]   ;;  %s1186_s4 = inlined_call_operand.vmem [shape: f32[64,1], index: 4, kind: input, shape index: {}]   ;;  %s1187_s5 = inlined_call_operand.vmem [shape: bf16[32,32], index: 5, kind: input, shape index: {}]   ;;  %s1188_s6 = inlined_call_operand.vmem [shape: bf16[2,32,16], index: 6, kind: output, shape index: {0}]   ;;  %s1189_s7 = inlined_call_operand.vmem [shape: f32[2,1,2,32], index: 7, kind: output, shape index: {1}]  }
   0x1   :  { %s1066_s26 = smov 0  }
   0x2 LB: > { %s30_s27 = sadd.s32 1, %s1014_s25  ;;  %p889_p0 = scmp.ge.s32.totalorder %s1018_s26, 1  ;;  %s1018_s26 = sphi %s1066_s26, %s18_s26   ;;  %s1014_s25 = sphi %s1064_s25, %s1191_s25   ;;  %s1010_s24 = sphi %s1062_s24, %s1190_s24  }
   0x3   : > { %p32_p1 = scmp.ge.s32.totalorder %s30_s27, 2  ;;  %p275_p2 = scmp.lt.s32.totalorder %s1018_s26, 3 }
   0x5   : > { %s1193_s27 = smov (%p32_p1, %s30_s27), 0  ;;  %p276_p3 = pnand %p889_p0, %p275_p2 }
   0x6   : > { %p327_p4 = scmp.lt.s32.totalorder (!%p276_p3), %s1010_s24, 1 }
   0x7   : > { %279 = sbr.rel (%p276_p3) target bundleno = 710 (0x2c6), region = 44 }
   0xc   : > { %v990_v0 = vld [vmem:[%s1185_s3] sm:$0xff]   ;;  %vm491_vm0 = vcmask 64512   ;;  %s1195_s24 = smov (!%p327_p4, %s1010_s24), 1  ;;  %vm504_vm1 = vcmask 1043456   ;;  %v1020_v1 = vmov 1   ;;  %v368_v3 = vld [vmem:[%s1183_s1 + $0x10] sm:$0xff] }
   0xd   : > { %940 = vmatprep.mubr.msk.bf16.mxu0 %vm491_vm0, %v990_v0  ;;  %s892_s30 = sshll.u32 %s1195_s24, 2  ;;  %986 = vset.pattern.permute.xlu0 %v1020_v1  ;;  %v366_v2 = vld [vmem:[%s1183_s1] sm:$0xff]  ;;  %v369_v5 = vld [vmem:[%s1183_s1 + $0x18] sm:$0xff]  ;;  %v991_v7 = vld [vmem:[%s1185_s3 + $0x8] sm:$0xff]   ;;  %v1021_v9 = vmov 0   ;;  %vm601_vm2 = vcmask 261120  }
   0xe   : > { %984 = vset.pattern.permute.xlu1 %v1020_v1  ;;  %s341_s14 = scalar_lea.vmem %s1184_s2, %s892_s30  ;;  %395 = vperm.xlu0 %986, %v366_v2   ;;  %v992_v8 = vld [vmem:[%s1185_s3 + $0x10] sm:$0xff]   ;;  %v426_v10 = vld [vmem:[%s1186_s4 + $0x18] sm:$0xff]  ;;  %v367_v13 = vld [vmem:[%s1183_s1 + $0x8] sm:$0xff]  ;;  %s914_s28 = sshll.u32 %s1195_s24, 4  ;;  %vm673_vm3 = vcmask 125952   ;;  %vm678_vm4 = vcmask 130048  }
   0xf   : > { %403 = vperm.xlu1 %984, %v368_v3   ;;  %v422_v4 = vld [vmem:[%s341_s14] sm:$0xf]  ;;  %v993_v11 = vld [vmem:[%s1185_s3 + $0x18] sm:$0xff]   ;;  %v425_v12 = vld [vmem:[%s1186_s4 + $0x10] sm:$0xff]  ;;  %s334_s8 = scalar_lea.vmem %s1182_s0, %s914_s28  ;;  %s349_s13 = scalar_lea.vmem %s1188_s6, %s914_s28  ;;  %vm707_vm5 = vcmask 7168   ;;  %vm744_vm6 = vcmask 254976  }
  0x10   : > { %956 = vmatprep.subr.msk.bf16.mxu0 %vm504_vm1, %v422_v4  ;;  %v506_v6 = vsel %vm504_vm1, %v422_v4, 0  ;;  %v430_v14 = vld [vmem:[%s1186_s4 + $0x38] sm:$0xff]  ;;  %v429_v15 = vld [vmem:[%s1186_s4 + $0x30] sm:$0xff]  ;;  %v424_v16 = vld [vmem:[%s1186_s4 + $0x8] sm:$0xff]  ;;  %s895_s14 = sshll.u32 %s1195_s24, 1 }
  0x11   : > { %939 = vmatpush3.bf16.msra.mxu0 %v506_v6  ;;  %v423_v17 = vld [vmem:[%s1186_s4] sm:$0xff]  ;;  %v428_v19 = vld [vmem:[%s1186_s4 + $0x28] sm:$0xff]  ;;  %s356_s17 = scalar_lea.vmem %s1189_s7, %s895_s14 }
  0x12   : > { %987 = vset.pattern.permute.xlu0 %v1021_v9  ;;  %v427_v18 = vld [vmem:[%s1186_s4 + $0x20] sm:$0xff]  ;;  %v928_v30 = vld [vmem:[%s334_s8 + $0x8] sm:$0xff]  }
  0x13   : > { %407 = vperm.xlu1 %984, %v369_v5   ;;  %382 = vperm.xlu0 %987, %v368_v3   ;;  %v994_v20 = vld [vmem:[%s1187_s5] sm:$0xff]   ;;  %v926_v35 = vunpack.c.l.bf16 %v928_v30  ;;  %v927_v36 = vunpack.c.h.bf16 %v928_v30 }
  0x14   : > { %941 = vmatmul.mubr.msk.bf16.vlgmr.msra.gmra.mxu0 %vm491_vm0, %v991_v7  ;;  %952 = vmatprep.mubr.msk.bf16.mxu1 %vm601_vm2, %v994_v20  ;;  %v921_v33 = vld [vmem:[%s334_s8] sm:$0xff]  }
  0x15   : > { %944 = vmatprep.mubr.msk.bf16.mxu0 %vm491_vm0, %v992_v8  ;;  %v922_v39 = vunpack.c.l.bf16 %v921_v33  ;;  %v923_v40 = vunpack.c.h.bf16 %v921_v33 }
  0x17   : > { %985 = vset.pattern.permute.xlu1 %v1021_v9  ;;  %387 = vperm.xlu0 %987, %v369_v5  }
  0x18   : > { %448 = vperm.xlu1 %985, %v426_v10  }
  0x1b   : > { %443 = vperm.xlu0 %987, %v425_v12  }
  0x1c   : > { %377 = vperm.xlu1 %985, %v367_v13   ;;  %945 = vmatmul.mubr.msk.bf16.gmra.mxu0 %vm491_vm0, %v993_v11 }
  0x1f   : > { %372 = vperm.xlu0 %987, %v366_v2  }
  0x20   : > { %468 = vperm.xlu1 %985, %v430_v14  }
  0x23   : > { %463 = vperm.xlu0 %987, %v429_v15  }
  0x24   : > { %988 = vset.pattern.permute.xlu1 %v1020_v1 }
  0x25   : > { %399 = vperm.xlu1 %988, %v367_v13  }
  0x27   : > { %438 = vperm.xlu0 %987, %v424_v16  }
  0x29   : > { %989 = vset.pattern.permute.xlu1 %v1021_v9 }
  0x2a   : > { %433 = vperm.xlu1 %989, %v423_v17   ;;  %v995_v17 = vld [vmem:[%s1187_s5 + $0x8] sm:$0xff]  }
  0x2e   : > { %453 = vperm.xlu1 %989, %v427_v18  }
  0x32   : > { %458 = vperm.xlu1 %989, %v428_v19  }
  0x89   : > { %v396_v22 = vpop.permute.xlu0 %395 }
  0x8a   : > { %v404_v21 = vpop.permute.xlu1 %403 }
  0x8e   : > { %v408_v23 = vpop.permute.xlu1 %407  ;;  %v383_v24 = vpop.permute.xlu0 %382 }
  0x8f   : > { %v392_v43 = vsub.f32 %v926_v35, %v383_v24 }
  0x91   : > { %v412_v51 = vmul.f32 %v404_v21, %v392_v43 }
  0x92   : > { %v388_v26 = vpop.permute.xlu0 %387 }
  0x93   : > { %v449_v25 = vpop.permute.xlu1 %448  ;;  %v393_v44 = vsub.f32 %v927_v36, %v388_v26 }
  0x95   : > { %v413_v55 = vmul.f32 %v408_v23, %v393_v44 }
  0x96   : > { %v444_v28 = vpop.permute.xlu0 %443 }
  0x97   : > { %v378_v27 = vpop.permute.xlu1 %377 }
  0x98   : > { %v391_v48 = vsub.f32 %v923_v40, %v378_v27 }
  0x9a   : > { %v373_v31 = vpop.permute.xlu0 %372 }
  0x9b   : > { %v469_v29 = vpop.permute.xlu1 %468  ;;  %v390_v46 = vsub.f32 %v922_v39, %v373_v31 }
  0x9d   : > { %v410_v58 = vmul.f32 %v396_v22, %v390_v46 }
  0x9e   : > { %v464_v41 = vpop.permute.xlu0 %463 }
  0xa0   : > { %v400_v32 = vpop.permute.xlu1 %399 }
  0xa1   : > { %v411_v62 = vmul.f32 %v400_v32, %v391_v48 }
  0xa2   : > { %v439_v56 = vpop.permute.xlu0 %438 }
  0xa5   : > { %v434_v37 = vpop.permute.xlu1 %433 }
  0xa9   : > { %v454_v49 = vpop.permute.xlu1 %453 }
  0xad   : > { %v459_v4 = vpop.permute.xlu1 %458 }
  0xd4   : > { %v942_v34 = vpop.f32.mrf.mxu0 }
  0xd5   : > { %v551_v47 = vadd.f32 %v942_v34, %v444_v28 }
  0xd6   : > { %v542_v38 = vpop.f32.mrf.mxu0 }
  0xd7   : > { %v543_v52 = vadd.f32 %v542_v38, %v434_v37  ;;  %v575_v59 = vmul.f32 %v551_v47, %v412_v51 }
  0xd8   : > { %v943_v42 = vpop.f32.mrf.mxu0 }
  0xd9   : > { %v554_v53 = vadd.f32 %v943_v42, %v449_v25  ;;  %v573_v0 = vmul.f32 %v543_v52, %v410_v58 }
  0xda   : > { %v545_v45 = vpop.f32.mrf.mxu0 }
  0xdb   : > { %v546_v60 = vadd.f32 %v545_v45, %v439_v56  ;;  %v576_v1 = vmul.f32 %v554_v53, %v413_v55 }
  0xdc   : > { %v946_v50 = vpop.f32.mrf.mxu0 }
  0xdd   : > { %v567_v54 = vadd.f32 %v946_v50, %v464_v41  ;;  %v574_v6 = vmul.f32 %v546_v60, %v411_v62 }
  0xde   : > { %v558_v57 = vpop.f32.mrf.mxu0 }
  0xdf   : > { %v559_v61 = vadd.f32 %v558_v57, %v454_v49  ;;  %v579_v2 = vadd.f32 %v575_v59, %v567_v54 }
  0xe0   : > { %v947_v63 = vpop.f32.mrf.mxu0 }
  0xe1   : > { %v570_v3 = vadd.f32 %v947_v63, %v469_v29  ;;  %v577_v7 = vadd.f32 %v573_v0, %v559_v61  ;;  %v583_v10 = vmax.f32 %v579_v2, 0.0 }
  0xe2   : > { %v561_v5 = vpop.f32.mrf.mxu0 }
  0xe3   : > { %v580_v8 = vadd.f32 %v576_v1, %v570_v3  ;;  %v562_v9 = vadd.f32 %v561_v5, %v459_v4  ;;  %v581_v13 = vmax.f32 %v577_v7, 0.0 }
  0xe5   : > { %v584_v11 = vmax.f32 %v580_v8, 0.0  ;;  %v578_v12 = vadd.f32 %v574_v6, %v562_v9 }
  0xe7   : > { %v582_v14 = vmax.f32 %v578_v12, 0.0  ;;  %v586_v15 = vpack.c.bf16 %v584_v11, %v583_v10 }
  0xe9   : > { %948 = vmatprep.subr.bf16.mxu1 %v586_v15  ;;  %v585_v16 = vpack.c.bf16 %v582_v14, %v581_v13 }
  0xea   : > { %949 = vmatpush3.bf16.msra.mxu1 %v586_v15 }
  0xeb   : > { %950 = vmatprep.subr.bf16.mxu1 %v585_v16 }
  0xee   : > { %951 = vmatpush3.bf16.msra.mxu1 %v585_v16 }
  0xf1   : > { %953 = vmatmul.mubr.msk.bf16.vlgmr.msra.gmra.mxu1 %vm601_vm2, %v995_v17 }
 0x1b1   : > { %v954_v18 = vpop.f32.mrf.mxu1 }
 0x1b2   : > { %v918_v19 = vpack.c.bf16 %v954_v18, %v954_v18  ;;  %v693_v24 = vmul.f32 %v954_v18, %v954_v18  ;;  %v685_v31 = vsel %vm678_vm4, %v954_v18, 0.0 }
 0x1b3   : > { %v642_v20 = vpop.f32.mrf.mxu1 }
 0x1b4   : > { %676 = vst.msk [vmem:[%s349_s13 + $0x8] sm:$0xf] %vm673_vm3, %v918_v19  ;;  %v916_v21 = vpack.c.bf16 %v642_v20, %v642_v20  ;;  %v679_v22 = vsel %vm678_vm4, %v642_v20, 0.0  ;;  %v691_v23 = vmul.f32 %v642_v20, %v642_v20  ;;  %v701_v30 = vsel %vm678_vm4, %v693_v24, 0.0 }
 0x1b5   : > { %680 = vadd.xlane.f32.xlu0 %v679_v22  ;;  %v955_v25 = vpop.f32.mrf.mxu1 }
 0x1b6   : > { %674 = vst.msk [vmem:[%s349_s13] sm:$0xf] %vm673_vm3, %v916_v21  ;;  %v919_v26 = vpack.c.bf16 %v955_v25, %v955_v25  ;;  %v695_v27 = vsel %vm678_vm4, %v691_v23, 0.0  ;;  %v688_v34 = vsel %vm678_vm4, %v955_v25, 0.0  ;;  %v694_v36 = vmul.f32 %v955_v25, %v955_v25 }
 0x1b7   : > { %696 = vadd.xlane.f32.xlu1 %v695_v27  ;;  %v645_v28 = vpop.f32.mrf.mxu1 }
 0x1b8   : > { %677 = vst.msk [vmem:[%s349_s13 + $0xc] sm:$0xf] %vm673_vm3, %v919_v26  ;;  %v917_v29 = vpack.c.bf16 %v645_v28, %v645_v28  ;;  %v692_v32 = vmul.f32 %v645_v28, %v645_v28  ;;  %v682_v33 = vsel %vm678_vm4, %v645_v28, 0.0  ;;  %v704_v37 = vsel %vm678_vm4, %v694_v36, 0.0 }
 0x1b9   : > { %702 = vadd.xlane.f32.xlu0 %v701_v30 }
 0x1ba   : > { %675 = vst.msk [vmem:[%s349_s13 + $0x4] sm:$0xf] %vm673_vm3, %v917_v29  ;;  %v698_v35 = vsel %vm678_vm4, %v692_v32, 0.0 }
 0x1bb   : > { %686 = vadd.xlane.f32.xlu1 %v685_v31 }
 0x1bd   : > { %683 = vadd.xlane.f32.xlu0 %v682_v33 }
 0x1bf   : > { %689 = vadd.xlane.f32.xlu1 %v688_v34 }
 0x1c1   : > { %699 = vadd.xlane.f32.xlu0 %v698_v35 }
 0x1c5   : > { %705 = vadd.xlane.f32.xlu0 %v704_v37 }
 0x23e   : > { %v681_v38 = vpop.xlane.xlu0 %680 }
 0x240   : > { %v697_v39 = vpop.xlane.xlu1 %696 }
 0x241   : > { %v708_v40 = vsel %vm707_vm5, %v681_v38, %v697_v39 }
 0x242   : > { %v703_v41 = vpop.xlane.xlu0 %702  ;;  %712 = vxpose.xlu1.b32.start [1/4] (short) (narrow) %v708_v40, 8 }
 0x244   : > { %v687_v45 = vpop.xlane.xlu1 %686 }
 0x245   : > { %v710_v46 = vsel %vm707_vm5, %v687_v45, %v703_v41 }
 0x246   : > { %v684_v42 = vpop.xlane.xlu0 %683 }
 0x248   : > { %v690_v48 = vpop.xlane.xlu1 %689 }
 0x24a   : > { %v700_v43 = vpop.xlane.xlu0 %699 }
 0x24b   : > { %v709_v44 = vsel %vm707_vm5, %v684_v42, %v700_v43 }
 0x24c   : > { %713 = vxpose.xlu1.b32.cont [2/4] (short) (narrow) %v709_v44, 8 }
 0x24e   : > { %v706_v47 = vpop.xlane.xlu0 %705 }
 0x24f   : > { %v711_v49 = vsel %vm707_vm5, %v690_v48, %v706_v47 }
 0x250   : > { %714 = vxpose.xlu1.b32.cont [3/4] (short) (narrow) %v710_v46, 8 }
 0x254   : > { %715 = vxpose.xlu1.b32.end [4/4] (short) (narrow) %v711_v49, 8 }
 0x2c4   : > { %v728_v50 = vpop.trf.xlu1 }
 0x2c5   : > { %745 = vst.msk [vmem:[%s356_s17] sm:$0x3] %vm744_vm6, %v728_v50 }
 0x2c6 PF: > { %s18_s26 = sadd.s32 1, %s1018_s26   ;;  %s1190_s24 = smov %s1014_s25 }
 0x2c7   : > { %p15_p5 = scmp.ge.s32.totalorder %s18_s26, 4   ;;  %s1191_s25 = smov %s1193_s27 }
 0x2c9   :  { %17 = sbr.rel (!%p15_p5) target bundleno = 2 (0x2), region = 89 }

// kernel: conditional_residual_decoder.8
= control target key start
LH: loop header
LB: loop body
LE: loop exit
PB: predicated region body
PF: predicated region fallthrough
CT: control target
= control target key end

     0   :  { %s1163_s27 = smov 0   ;;  %s1165_s28 = smov 0   ;;  %s1287_s0 = inlined_call_operand.vmem [shape: bf16[2,32,16], index: 0, kind: input, shape index: {}]   ;;  %s1288_s1 = inlined_call_operand.vmem [shape: f32[32,2], index: 1, kind: input, shape index: {}]   ;;  %s1289_s2 = inlined_call_operand.vmem [shape: bf16[2,8,16], index: 2, kind: input, shape index: {}]   ;;  %s1290_s3 = inlined_call_operand.vmem [shape: bf16[2,32,16], index: 3, kind: input, shape index: {}]   ;;  %s1291_s4 = inlined_call_operand.vmem [shape: bf16[64,8], index: 4, kind: input, shape index: {}]   ;;  %s1292_s5 = inlined_call_operand.vmem [shape: f32[64,1], index: 5, kind: input, shape index: {}]   ;;  %s1293_s6 = inlined_call_operand.vmem [shape: bf16[32,32], index: 6, kind: input, shape index: {}]   ;;  %s1294_s7 = inlined_call_operand.vmem [shape: bf16[2,32,16], index: 7, kind: output, shape index: {0}]   ;;  %s1295_s8 = inlined_call_operand.vmem [shape: f32[2,1,2,32], index: 8, kind: output, shape index: {1}]  }
   0x1   :  { %s1167_s29 = smov 0  }
   0x2 LB: > { %s31_s30 = sadd.s32 1, %s1110_s28  ;;  %p973_p0 = scmp.ge.s32.totalorder %s1114_s29, 1  ;;  %s1114_s29 = sphi %s1167_s29, %s19_s29   ;;  %s1110_s28 = sphi %s1165_s28, %s1297_s28   ;;  %s1106_s27 = sphi %s1163_s27, %s1296_s27  }
   0x3   : > { %p33_p1 = scmp.ge.s32.totalorder %s31_s30, 2  ;;  %p315_p2 = scmp.lt.s32.totalorder %s1114_s29, 3 }
   0x5   : > { %s1299_s30 = smov (%p33_p1, %s31_s30), 0  ;;  %p316_p3 = pnand %p973_p0, %p315_p2 }
   0x6   : > { %p377_p4 = scmp.lt.s32.totalorder (!%p316_p3), %s1106_s27, 1 }
   0x7   : > { %319 = sbr.rel (%p316_p3) target bundleno = 712 (0x2c8), region = 48 }
   0xc   : > { %v1086_v0 = vld [vmem:[%s1291_s4] sm:$0xff]   ;;  %vm549_vm0 = vcmask 64512   ;;  %s1301_s27 = smov (!%p377_p4, %s1106_s27), 1  ;;  %vm562_vm1 = vcmask 1043456   ;;  %v1116_v1 = vmov 1   ;;  %v426_v3 = vld [vmem:[%s1288_s1 + $0x10] sm:$0xff] }
   0xd   : > { %1036 = vmatprep.mubr.msk.bf16.mxu0 %vm549_vm0, %v1086_v0  ;;  %s976_s11 = sshll.u32 %s1301_s27, 2  ;;  %1082 = vset.pattern.permute.xlu0 %v1116_v1  ;;  %v424_v2 = vld [vmem:[%s1288_s1] sm:$0xff]  ;;  %v427_v5 = vld [vmem:[%s1288_s1 + $0x18] sm:$0xff]  ;;  %v1087_v7 = vld [vmem:[%s1291_s4 + $0x8] sm:$0xff]   ;;  %v1117_v9 = vmov 0   ;;  %vm667_vm2 = vcmask 261120  }
   0xe   : > { %1080 = vset.pattern.permute.xlu1 %v1116_v1  ;;  %s391_s18 = scalar_lea.vmem %s1289_s2, %s976_s11  ;;  %453 = vperm.xlu0 %1082, %v424_v2   ;;  %v1088_v8 = vld [vmem:[%s1291_s4 + $0x10] sm:$0xff]   ;;  %v484_v10 = vld [vmem:[%s1292_s5 + $0x18] sm:$0xff]  ;;  %v425_v13 = vld [vmem:[%s1288_s1 + $0x8] sm:$0xff]  ;;  %s1244_s11 = sshll.u32 %s1301_s27, 4  ;;  %vm739_vm3 = vcmask 125952   ;;  %vm744_vm4 = vcmask 130048  }
   0xf   : > { %461 = vperm.xlu1 %1080, %v426_v3   ;;  %v480_v4 = vld [vmem:[%s391_s18] sm:$0xf]  ;;  %v1089_v11 = vld [vmem:[%s1291_s4 + $0x18] sm:$0xff]   ;;  %v483_v12 = vld [vmem:[%s1292_s5 + $0x10] sm:$0xff]  ;;  %s384_s14 = scalar_lea.vmem %s1287_s0, %s1244_s11  ;;  %s399_s19 = scalar_lea.vmem %s1290_s3, %s1244_s11  ;;  %vm773_vm5 = vcmask 7168   ;;  %vm810_vm6 = vcmask 254976  }
  0x10   : > { %1052 = vmatprep.subr.msk.bf16.mxu0 %vm562_vm1, %v480_v4  ;;  %v564_v6 = vsel %vm562_vm1, %v480_v4, 0  ;;  %v488_v14 = vld [vmem:[%s1292_s5 + $0x38] sm:$0xff]  ;;  %v487_v15 = vld [vmem:[%s1292_s5 + $0x30] sm:$0xff]  ;;  %v482_v16 = vld [vmem:[%s1292_s5 + $0x8] sm:$0xff]  ;;  %s407_s22 = scalar_lea.vmem %s1294_s7, %s1244_s11  ;;  %s981_s23 = sshll.u32 %s1301_s27, 1 }
  0x11   : > { %1035 = vmatpush3.bf16.msra.mxu0 %v564_v6  ;;  %v481_v17 = vld [vmem:[%s1292_s5] sm:$0xff]  ;;  %v486_v19 = vld [vmem:[%s1292_s5 + $0x28] sm:$0xff]  ;;  %s414_s26 = scalar_lea.vmem %s1295_s8, %s981_s23 }
  0x12   : > { %1083 = vset.pattern.permute.xlu0 %v1117_v9  ;;  %v485_v18 = vld [vmem:[%s1292_s5 + $0x20] sm:$0xff]  ;;  %v1023_v30 = vld [vmem:[%s384_s14 + $0x8] sm:$0xff]  }
  0x13   : > { %465 = vperm.xlu1 %1080, %v427_v5   ;;  %440 = vperm.xlu0 %1083, %v426_v3   ;;  %v1090_v20 = vld [vmem:[%s1293_s6] sm:$0xff]   ;;  %v1013_v35 = vunpack.c.l.bf16 %v1023_v30  ;;  %v1014_v36 = vunpack.c.h.bf16 %v1023_v30 }
  0x14   : > { %1037 = vmatmul.mubr.msk.bf16.vlgmr.msra.gmra.mxu0 %vm549_vm0, %v1087_v7  ;;  %1048 = vmatprep.mubr.msk.bf16.mxu1 %vm667_vm2, %v1090_v20  ;;  %v1008_v33 = vld [vmem:[%s384_s14] sm:$0xff]  }
  0x15   : > { %1040 = vmatprep.mubr.msk.bf16.mxu0 %vm549_vm0, %v1088_v8  ;;  %v1009_v39 = vunpack.c.l.bf16 %v1008_v33  ;;  %v1010_v40 = vunpack.c.h.bf16 %v1008_v33 }
  0x17   : > { %1081 = vset.pattern.permute.xlu1 %v1117_v9  ;;  %445 = vperm.xlu0 %1083, %v427_v5  }
  0x18   : > { %506 = vperm.xlu1 %1081, %v484_v10  }
  0x1b   : > { %501 = vperm.xlu0 %1083, %v483_v12  }
  0x1c   : > { %435 = vperm.xlu1 %1081, %v425_v13   ;;  %1041 = vmatmul.mubr.msk.bf16.gmra.mxu0 %vm549_vm0, %v1089_v11 }
  0x1f   : > { %430 = vperm.xlu0 %1083, %v424_v2  }
  0x20   : > { %526 = vperm.xlu1 %1081, %v488_v14  }
  0x23   : > { %521 = vperm.xlu0 %1083, %v487_v15  }
  0x24   : > { %1084 = vset.pattern.permute.xlu1 %v1116_v1 }
  0x25   : > { %457 = vperm.xlu1 %1084, %v425_v13  }
  0x27   : > { %496 = vperm.xlu0 %1083, %v482_v16  }
  0x29   : > { %1085 = vset.pattern.permute.xlu1 %v1117_v9 }
  0x2a   : > { %491 = vperm.xlu1 %1085, %v481_v17   ;;  %v1091_v17 = vld [vmem:[%s1293_s6 + $0x8] sm:$0xff]  }
  0x2e   : > { %511 = vperm.xlu1 %1085, %v485_v18   ;;  %v1024_v18 = vld [vmem:[%s399_s19 + $0x8] sm:$0xff]  }
  0x2f   : > { %v1021_v20 = vunpack.c.l.bf16 %v1024_v18 }
  0x32   : > { %516 = vperm.xlu1 %1085, %v486_v19   ;;  %v1016_v19 = vld [vmem:[%s399_s19] sm:$0xff]  }
  0x89   : > { %v454_v22 = vpop.permute.xlu0 %453 }
  0x8a   : > { %v462_v21 = vpop.permute.xlu1 %461 }
  0x8e   : > { %v466_v23 = vpop.permute.xlu1 %465  ;;  %v441_v24 = vpop.permute.xlu0 %440 }
  0x8f   : > { %v450_v43 = vsub.f32 %v1013_v35, %v441_v24  ;;  %v1022_v24 = vunpack.c.h.bf16 %v1024_v18 }
  0x91   : > { %v470_v51 = vmul.f32 %v462_v21, %v450_v43  ;;  %v1017_v21 = vunpack.c.l.bf16 %v1016_v19 }
  0x92   : > { %v446_v26 = vpop.permute.xlu0 %445 }
  0x93   : > { %v507_v25 = vpop.permute.xlu1 %506  ;;  %v451_v44 = vsub.f32 %v1014_v36, %v446_v26 }
  0x95   : > { %v471_v55 = vmul.f32 %v466_v23, %v451_v44 }
  0x96   : > { %v502_v28 = vpop.permute.xlu0 %501 }
  0x97   : > { %v436_v27 = vpop.permute.xlu1 %435 }
  0x98   : > { %v449_v48 = vsub.f32 %v1010_v40, %v436_v27 }
  0x9a   : > { %v431_v31 = vpop.permute.xlu0 %430 }
  0x9b   : > { %v527_v29 = vpop.permute.xlu1 %526  ;;  %v448_v46 = vsub.f32 %v1009_v39, %v431_v31 }
  0x9d   : > { %v468_v58 = vmul.f32 %v454_v22, %v448_v46 }
  0x9e   : > { %v522_v41 = vpop.permute.xlu0 %521 }
  0xa0   : > { %v458_v32 = vpop.permute.xlu1 %457 }
  0xa1   : > { %v469_v62 = vmul.f32 %v458_v32, %v449_v48 }
  0xa2   : > { %v497_v56 = vpop.permute.xlu0 %496 }
  0xa5   : > { %v492_v37 = vpop.permute.xlu1 %491 }
  0xa9   : > { %v512_v49 = vpop.permute.xlu1 %511 }
  0xad   : > { %v517_v4 = vpop.permute.xlu1 %516 }
  0xd4   : > { %v1038_v34 = vpop.f32.mrf.mxu0 }
  0xd5   : > { %v609_v47 = vadd.f32 %v1038_v34, %v502_v28  ;;  %v1018_v28 = vunpack.c.h.bf16 %v1016_v19 }
  0xd6   : > { %v600_v38 = vpop.f32.mrf.mxu0 }
  0xd7   : > { %v601_v52 = vadd.f32 %v600_v38, %v492_v37  ;;  %v633_v59 = vmul.f32 %v609_v47, %v470_v51 }
  0xd8   : > { %v1039_v42 = vpop.f32.mrf.mxu0 }
  0xd9   : > { %v612_v53 = vadd.f32 %v1039_v42, %v507_v25  ;;  %v631_v0 = vmul.f32 %v601_v52, %v468_v58 }
  0xda   : > { %v603_v45 = vpop.f32.mrf.mxu0 }
  0xdb   : > { %v604_v60 = vadd.f32 %v603_v45, %v497_v56  ;;  %v634_v1 = vmul.f32 %v612_v53, %v471_v55 }
  0xdc   : > { %v1042_v50 = vpop.f32.mrf.mxu0 }
  0xdd   : > { %v625_v54 = vadd.f32 %v1042_v50, %v522_v41  ;;  %v632_v6 = vmul.f32 %v604_v60, %v469_v62 }
  0xde   : > { %v616_v57 = vpop.f32.mrf.mxu0 }
  0xdf   : > { %v617_v61 = vadd.f32 %v616_v57, %v512_v49  ;;  %v637_v2 = vadd.f32 %v633_v59, %v625_v54 }
  0xe0   : > { %v1043_v63 = vpop.f32.mrf.mxu0 }
  0xe1   : > { %v628_v3 = vadd.f32 %v1043_v63, %v527_v29  ;;  %v635_v7 = vadd.f32 %v631_v0, %v617_v61  ;;  %v641_v10 = vmax.f32 %v637_v2, 0.0 }
  0xe2   : > { %v619_v5 = vpop.f32.mrf.mxu0 }
  0xe3   : > { %v638_v8 = vadd.f32 %v634_v1, %v628_v3  ;;  %v620_v9 = vadd.f32 %v619_v5, %v517_v4  ;;  %v639_v13 = vmax.f32 %v635_v7, 0.0 }
  0xe5   : > { %v642_v11 = vmax.f32 %v638_v8, 0.0  ;;  %v636_v12 = vadd.f32 %v632_v6, %v620_v9 }
  0xe7   : > { %v640_v14 = vmax.f32 %v636_v12, 0.0  ;;  %v644_v15 = vpack.c.bf16 %v642_v11, %v641_v10 }
  0xe9   : > { %1044 = vmatprep.subr.bf16.mxu1 %v644_v15  ;;  %v643_v16 = vpack.c.bf16 %v640_v14, %v639_v13 }
  0xea   : > { %1045 = vmatpush3.bf16.msra.mxu1 %v644_v15 }
  0xeb   : > { %1046 = vmatprep.subr.bf16.mxu1 %v643_v16 }
  0xee   : > { %1047 = vmatpush3.bf16.msra.mxu1 %v643_v16 }
  0xf1   : > { %1049 = vmatmul.mubr.msk.bf16.vlgmr.msra.gmra.mxu1 %vm667_vm2, %v1091_v17 }
 0x1b1   : > { %v1050_v22 = vpop.f32.mrf.mxu1 }
 0x1b2   : > { %v717_v23 = vadd.f32 %v1050_v22, %v1021_v20 }
 0x1b3   : > { %v708_v25 = vpop.f32.mrf.mxu1 }
 0x1b4   : > { %v1005_v26 = vpack.c.bf16 %v717_v23, %v717_v23  ;;  %v709_v27 = vadd.f32 %v1017_v21, %v708_v25  ;;  %v759_v30 = vmul.f32 %v717_v23, %v717_v23  ;;  %v751_v41 = vsel %vm744_vm4, %v717_v23, 0.0 }
 0x1b5   : > { %v1051_v29 = vpop.f32.mrf.mxu1 }
 0x1b6   : > { %742 = vst.msk [vmem:[%s407_s22 + $0x8] sm:$0xf] %vm739_vm3, %v1005_v26  ;;  %v1003_v31 = vpack.c.bf16 %v709_v27, %v709_v27  ;;  %v720_v32 = vadd.f32 %v1051_v29, %v1022_v24  ;;  %v745_v33 = vsel %vm744_vm4, %v709_v27, 0.0  ;;  %v757_v34 = vmul.f32 %v709_v27, %v709_v27 }
 0x1b7   : > { %v711_v35 = vpop.f32.mrf.mxu1  ;;  %746 = vadd.xlane.f32.xlu0 %v745_v33  ;;  %v767_v40 = vsel %vm744_vm4, %v759_v30, 0.0 }
 0x1b8   : > { %740 = vst.msk [vmem:[%s407_s22] sm:$0xf] %vm739_vm3, %v1003_v31  ;;  %v1006_v36 = vpack.c.bf16 %v720_v32, %v720_v32  ;;  %v712_v37 = vadd.f32 %v1018_v28, %v711_v35  ;;  %v761_v38 = vsel %vm744_vm4, %v757_v34, 0.0  ;;  %v754_v44 = vsel %vm744_vm4, %v720_v32, 0.0 }
 0x1b9   : > { %762 = vadd.xlane.f32.xlu1 %v761_v38  ;;  %v760_v46 = vmul.f32 %v720_v32, %v720_v32 }
 0x1ba   : > { %743 = vst.msk [vmem:[%s407_s22 + $0xc] sm:$0xf] %vm739_vm3, %v1006_v36  ;;  %v1004_v39 = vpack.c.bf16 %v712_v37, %v712_v37  ;;  %v748_v42 = vsel %vm744_vm4, %v712_v37, 0.0  ;;  %v758_v43 = vmul.f32 %v712_v37, %v712_v37 }
 0x1bb   : > { %768 = vadd.xlane.f32.xlu0 %v767_v40  ;;  %v770_v47 = vsel %vm744_vm4, %v760_v46, 0.0 }
 0x1bc   : > { %741 = vst.msk [vmem:[%s407_s22 + $0x4] sm:$0xf] %vm739_vm3, %v1004_v39  ;;  %v764_v45 = vsel %vm744_vm4, %v758_v43, 0.0 }
 0x1bd   : > { %752 = vadd.xlane.f32.xlu1 %v751_v41 }
 0x1bf   : > { %749 = vadd.xlane.f32.xlu0 %v748_v42 }
 0x1c1   : > { %755 = vadd.xlane.f32.xlu1 %v754_v44 }
 0x1c3   : > { %765 = vadd.xlane.f32.xlu0 %v764_v45 }
 0x1c7   : > { %771 = vadd.xlane.f32.xlu0 %v770_v47 }
 0x240   : > { %v747_v48 = vpop.xlane.xlu0 %746 }
 0x242   : > { %v763_v49 = vpop.xlane.xlu1 %762 }
 0x243   : > { %v774_v50 = vsel %vm773_vm5, %v747_v48, %v763_v49 }
 0x244   : > { %778 = vxpose.xlu1.b32.start [1/4] (short) (narrow) %v774_v50, 8  ;;  %v769_v51 = vpop.xlane.xlu0 %768 }
 0x246   : > { %v753_v55 = vpop.xlane.xlu1 %752 }
 0x247   : > { %v776_v56 = vsel %vm773_vm5, %v753_v55, %v769_v51 }
 0x248   : > { %v750_v52 = vpop.xlane.xlu0 %749 }
 0x24a   : > { %v756_v58 = vpop.xlane.xlu1 %755 }
 0x24c   : > { %v766_v53 = vpop.xlane.xlu0 %765 }
 0x24d   : > { %v775_v54 = vsel %vm773_vm5, %v750_v52, %v766_v53 }
 0x24e   : > { %779 = vxpose.xlu1.b32.cont [2/4] (short) (narrow) %v775_v54, 8 }
 0x250   : > { %v772_v57 = vpop.xlane.xlu0 %771 }
 0x251   : > { %v777_v59 = vsel %vm773_vm5, %v756_v58, %v772_v57 }
 0x252   : > { %780 = vxpose.xlu1.b32.cont [3/4] (short) (narrow) %v776_v56, 8 }
 0x256   : > { %781 = vxpose.xlu1.b32.end [4/4] (short) (narrow) %v777_v59, 8 }
 0x2c6   : > { %v794_v60 = vpop.trf.xlu1 }
 0x2c7   : > { %811 = vst.msk [vmem:[%s414_s26] sm:$0x3] %vm810_vm6, %v794_v60 }
 0x2c8 PF: > { %s19_s29 = sadd.s32 1, %s1114_s29   ;;  %s1296_s27 = smov %s1110_s28 }
 0x2c9   : > { %p16_p5 = scmp.ge.s32.totalorder %s19_s29, 4   ;;  %s1297_s28 = smov %s1299_s30 }
 0x2cb   :  { %18 = sbr.rel (!%p16_p5) target bundleno = 2 (0x2), region = 96 }

// kernel: conditional_residual_decoder.11
= control target key start
LH: loop header
LB: loop body
LE: loop exit
PB: predicated region body
PF: predicated region fallthrough
CT: control target
= control target key end

     0   :  { %12 = vsyncpa [#allocation3], 0  ;;  %s1147_s0 = inlined_call_operand.vmem [shape: bf16[2,32,16], index: 0, kind: input, shape index: {}]   ;;  %s1148_s1 = inlined_call_operand.vmem [shape: f32[32,2], index: 1, kind: input, shape index: {}]   ;;  %s1149_s2 = inlined_call_operand.vmem [shape: bf16[2,8,16], index: 2, kind: input, shape index: {}]   ;;  %s1150_s3 = inlined_call_operand.vmem [shape: bf16[64,8], index: 3, kind: input, shape index: {}]   ;;  %s1151_s4 = inlined_call_operand.vmem [shape: f32[64,1], index: 4, kind: input, shape index: {}]   ;;  %s1152_s5 = inlined_call_operand.vmem [shape: bf16[4,32], index: 5, kind: input, shape index: {}]   ;;  %s1153_s6 = inlined_call_operand.vmem [shape: f32[4,1], index: 6, kind: input, shape index: {}]   ;;  %s1154_s7 = inlined_call_operand.hbm [shape: f32[2,4,16], index: 7, kind: output, shape index: {}]  }
   0x1   :  { %14 = vsyncpa [#allocation3 + $0x1], 0  ;;  %s968_s24 = smov 0   ;;  %s970_s25 = smov 0  }
   0x2   :  { %s972_s26 = smov 0   ;;  %s974_s27 = smov 0  }
   0x3   :  { %s976_s28 = smov 0   ;;  %s978_s29 = smov 0  }
   0x4 LB: > { %s717_s30 = sadd.s32 4294967295, %s921_s29   ;;  %s718_s8 = sadd.s32 4294967294, %s921_s29   ;;  %s921_s29 = sphi %s978_s29, %s20_s29   ;;  %s917_s28 = sphi %s976_s28, %s1161_s28   ;;  %s913_s27 = sphi %s974_s27, %s1160_s27   ;;  %s909_s26 = sphi %s972_s26, %s1159_s26   ;;  %s905_s25 = sphi %s970_s25, %s1158_s25   ;;  %s901_s24 = sphi %s968_s24, %s1157_s24  }
   0x5   : > { %s32_s9 = sadd.s32 1, %s917_s28  ;;  %s202_s10 = sadd.s32 1, %s909_s26 }
   0x6   : > { %p34_p0 = scmp.ge.s32.totalorder %s32_s9, 2  ;;  %p212_p1 = scmp.ne.s32.totalorder %s909_s26, %s905_s25 }
   0x7   : > { %p213_p2 = scmp.eq.s32.totalorder %s717_s30, 1  ;;  %p218_p3 = scmp.ne.s32.totalorder %s905_s25, %s901_s24 }
   0x8   : > { %s1163_s9 = smov (%p34_p0, %s32_s9), 0  ;;  %p219_p5 = scmp.eq.s32.totalorder %s718_s8, 1 }
   0x9   : > { %p1008_p4 = por %p213_p2, %p212_p1  ;;  %s197_s12 = ssub.s32 %s917_s28, %s1163_s9 }
   0xa   : > { %p721_p6 = scmp.ge.s32.totalorder %s921_s29, 1  ;;  %p200_p7 = scmp.eq.s32.totalorder %s197_s12, 0 }
   0xb   : > { %p1015_p8 = por %p219_p5, %p218_p3  ;;  %p273_p9 = scmp.lt.s32.totalorder %s921_s29, 3 }
   0xc   : > { %s1021_s14 = scalar_select %p200_p7, %s909_s26, %s202_s10  }
   0xd   : > { %p274_p10 = pnand %p721_p6, %p273_p9 }
   0xe   : > { %p315_p11 = scmp.lt.s32.totalorder (!%p274_p10), %s913_s27, 1  ;;  %s312_s23 = sand.u32 (!%p274_p10), 1, %s905_s25  }
   0xf   : > { %277 = sbr.rel (%p274_p10) target bundleno = 458 (0x1ca), region = 48  ;;  %s722_s30 = sshll.u32 (!%p274_p10), %s312_s23, 2 }
  0x10   : > { %s314_s10 = scalar_lea.vmem (!%p274_p10), [#allocation2], %s722_s30 }
  0x11   : > { %s628_s12 = sshll.u32 (!%p274_p10), %s314_s10, 4  ;;  %s1103_s12 = int_to_ptr.vmem [resolvable:$true] %s628_s12 }
  0x12   : > { %s845_s20 = scalar_lea.vmem (!%p274_p10), %s1103_s12, 64 }
  0x13   : > { %p846_p12 = scmp.ne.s32.totalorder (!%p274_p10), %s1103_s12, %s845_s20 }
  0x14   : > { %v841_v0 = vld [vmem:[%s1150_s3] sm:$0xff]   ;;  %vm464_vm0 = vcmask 64512   ;;  %s1028_s17 = scalar_select %p315_p11, %s913_s27, 1  ;;  %vm477_vm1 = vcmask 1043456   ;;  %v923_v1 = vmov 1   ;;  %v341_v3 = vld [vmem:[%s1148_s1 + $0x10] sm:$0xff] }
  0x15   : > { %759 = vmatprep.mubr.msk.bf16.mxu0 %vm464_vm0, %v841_v0  ;;  %837 = vset.pattern.permute.xlu0 %v923_v1  ;;  %v339_v2 = vld [vmem:[%s1148_s1] sm:$0xff]  ;;  %v342_v5 = vld [vmem:[%s1148_s1 + $0x18] sm:$0xff]  ;;  %v842_v7 = vld [vmem:[%s1150_s3 + $0x8] sm:$0xff]   ;;  %v924_v9 = vmov 0   ;;  %v925_v21 = vmov 0.0   ;;  %vm926_vm2 = vmmov 0   ;;  %p847_p13 = pnand %p846_p12, %p1008_p4 }
  0x16   : > { %s725_s18 = sshll.u32 %s1028_s17, 2  ;;  %835 = vset.pattern.permute.xlu1 %v923_v1  ;;  %368 = vperm.xlu0 %837, %v339_v2   ;;  %v843_v8 = vld [vmem:[%s1150_s3 + $0x10] sm:$0xff]   ;;  %v399_v10 = vld [vmem:[%s1151_s4 + $0x18] sm:$0xff]  ;;  %v340_v13 = vld [vmem:[%s1148_s1 + $0x8] sm:$0xff]  ;;  %s739_s19 = sshll.u32 %s1028_s17, 4  ;;  %vm567_vm3 = vcmask 261120  }
  0x17   : > { %s329_s8 = scalar_lea.vmem %s1149_s2, %s725_s18  ;;  %376 = vperm.xlu1 %835, %v341_v3   ;;  %v844_v11 = vld [vmem:[%s1150_s3 + $0x18] sm:$0xff]   ;;  %v398_v12 = vld [vmem:[%s1151_s4 + $0x10] sm:$0xff]  ;;  %v397_v16 = vld [vmem:[%s1151_s4 + $0x8] sm:$0xff]  ;;  %767 = vmatprep.subr.bf16.mxu1 %v925_v21  ;;  %s322_s21 = scalar_lea.vmem %s1147_s0, %s739_s19  ;;  %vm611_vm4 = vcmask 125952  }
  0x18   : > { %v395_v4 = vld [vmem:[%s329_s8] sm:$0xf]  ;;  %v403_v14 = vld [vmem:[%s1151_s4 + $0x38] sm:$0xff]  ;;  %v402_v15 = vld [vmem:[%s1151_s4 + $0x30] sm:$0xff]  ;;  %771 = vmatprep.mubr.msk.bf16.mxu1 %vm926_vm2, %v925_v21  ;;  %s736_s8 = sshll.u32 %s913_s27, 6  ;;  %s614_s27 = scalar_lea.sflag [#allocation3], %s312_s23 }
  0x19   : > { %775 = vmatprep.subr.msk.bf16.mxu0 %vm477_vm1, %v395_v4  ;;  %v479_v6 = vsel %vm477_vm1, %v395_v4, 0  ;;  %v396_v17 = vld [vmem:[%s1151_s4] sm:$0xff]  ;;  %v401_v20 = vld [vmem:[%s1151_s4 + $0x28] sm:$0xff]  ;;  %s1101_s19 = scalar_lea.hbm %s1154_s7, %s736_s8  ;;  %p848_p0 = pneg %p847_p13 }
  0x1a   : > { %758 = vmatpush3.bf16.msra.mxu0 %v479_v6  ;;  %838 = vset.pattern.permute.xlu0 %v924_v9  ;;  %v561_v18 = vld [vmem:[%s1153_s6] sm:$0xf]  ;;  %v748_v31 = vld [vmem:[%s322_s21 + $0x8] sm:$0xff]   ;;  %s927_s18 = smov [#allocation2]  }
  0x1b   : > { %380 = vperm.xlu1 %835, %v342_v5   ;;  %355 = vperm.xlu0 %838, %v341_v3   ;;  %v400_v19 = vld [vmem:[%s1151_s4 + $0x20] sm:$0xff]  ;;  %v746_v35 = vunpack.c.l.bf16 %v748_v31  ;;  %v747_v39 = vunpack.c.h.bf16 %v748_v31 }
  0x1c   : > { %v741_v36 = vld [vmem:[%s322_s21] sm:$0xff]   ;;  %s849_s21 = sshll.u32 %s927_s18, 4  ;;  %s850_s21 = int_to_ptr.vmem [resolvable:$false] %s849_s21 }
  0x1d   : > { %760 = vmatmul.mubr.msk.bf16.vlgmr.msra.gmra.mxu0 %vm464_vm0, %v842_v7  ;;  %v742_v40 = vunpack.c.l.bf16 %v741_v36  ;;  %v743_v41 = vunpack.c.h.bf16 %v741_v36  ;;  %s851_s17 = scalar_lea.vmem %s850_s21, 128  ;;  %p852_p1 = scmp.lt.s32.totalorder %s1103_s12, %s850_s21 }
  0x1e   : > { %763 = vmatprep.mubr.msk.bf16.mxu0 %vm464_vm0, %v843_v8  ;;  %p853_p2 = scmp.lt.s32.totalorder %s851_s17, %s845_s20 }
  0x1f   : > { %836 = vset.pattern.permute.xlu1 %v924_v9  ;;  %360 = vperm.xlu0 %838, %v342_v5  }
  0x20   : > { %421 = vperm.xlu1 %836, %v399_v10   ;;  %p854_p3 = por %p853_p2, %p852_p1 }
  0x22   : > { %p855_p5 = pnand %p854_p3, %p848_p0 }
  0x23   : > { %416 = vperm.xlu0 %838, %v398_v12  }
  0x24   : > { %350 = vperm.xlu1 %836, %v340_v13  }
  0x25   : > { %764 = vmatmul.mubr.msk.bf16.gmra.mxu0 %vm464_vm0, %v844_v11 }
  0x27   : > { %345 = vperm.xlu0 %838, %v339_v2  }
  0x28   : > { %441 = vperm.xlu1 %836, %v403_v14  }
  0x2b   : > { %436 = vperm.xlu0 %838, %v402_v15  }
  0x2c   : > { %839 = vset.pattern.permute.xlu1 %v923_v1 }
  0x2d   : > { %372 = vperm.xlu1 %839, %v340_v13  }
  0x2f   : > { %411 = vperm.xlu0 %838, %v397_v16  }
  0x31   : > { %840 = vset.pattern.permute.xlu1 %v924_v9 }
  0x32   : > { %406 = vperm.xlu1 %840, %v396_v17  }
  0x33   : > { %564 = vperm.xlu0 %838, %v561_v18   ;;  %v560_v18 = vld [vmem:[%s1152_s5] sm:$0x3] }
  0x36   : > { %426 = vperm.xlu1 %840, %v400_v19  }
  0x3a   : > { %431 = vperm.xlu1 %840, %v401_v20  }
  0x91   : > { %v369_v23 = vpop.permute.xlu0 %368 }
  0x92   : > { %v377_v22 = vpop.permute.xlu1 %376 }
  0x96   : > { %v381_v24 = vpop.permute.xlu1 %380  ;;  %v356_v25 = vpop.permute.xlu0 %355 }
  0x97   : > { %v365_v44 = vsub.f32 %v746_v35, %v356_v25 }
  0x99   : > { %v385_v52 = vmul.f32 %v377_v22, %v365_v44 }
  0x9a   : > { %v361_v27 = vpop.permute.xlu0 %360 }
  0x9b   : > { %v422_v26 = vpop.permute.xlu1 %421  ;;  %v366_v46 = vsub.f32 %v747_v39, %v361_v27 }
  0x9d   : > { %v386_v57 = vmul.f32 %v381_v24, %v366_v46 }
  0x9e   : > { %v417_v29 = vpop.permute.xlu0 %416 }
  0x9f   : > { %v351_v28 = vpop.permute.xlu1 %350 }
  0xa0   : > { %v364_v49 = vsub.f32 %v743_v41, %v351_v28 }
  0xa2   : > { %v346_v32 = vpop.permute.xlu0 %345 }
  0xa3   : > { %v442_v30 = vpop.permute.xlu1 %441  ;;  %v363_v48 = vsub.f32 %v742_v40, %v346_v32 }
  0xa5   : > { %v383_v61 = vmul.f32 %v369_v23, %v363_v48 }
  0xa6   : > { %v437_v42 = vpop.permute.xlu0 %436 }
  0xa8   : > { %v373_v33 = vpop.permute.xlu1 %372 }
  0xa9   : > { %v384_v62 = vmul.f32 %v373_v33, %v364_v49 }
  0xaa   : > { %v412_v55 = vpop.permute.xlu0 %411 }
  0xad   : > { %v407_v37 = vpop.permute.xlu1 %406 }
  0xae   : > { %v565_v19 = vpop.permute.xlu0 %564 }
  0xb1   : > { %v427_v50 = vpop.permute.xlu1 %426 }
  0xb5   : > { %v432_v4 = vpop.permute.xlu1 %431 }
  0xdd   : > { %v761_v34 = vpop.f32.mrf.mxu0 }
  0xde   : > { %v524_v47 = vadd.f32 %v761_v34, %v417_v29 }
  0xdf   : > { %v515_v38 = vpop.f32.mrf.mxu0 }
  0xe0   : > { %v548_v58 = vmul.f32 %v524_v47, %v385_v52  ;;  %v516_v59 = vadd.f32 %v515_v38, %v407_v37 }
  0xe1   : > { %v762_v43 = vpop.f32.mrf.mxu0 }
  0xe2   : > { %v527_v53 = vadd.f32 %v762_v43, %v422_v26  ;;  %v546_v6 = vmul.f32 %v516_v59, %v383_v61 }
  0xe3   : > { %v518_v45 = vpop.f32.mrf.mxu0 }
  0xe4   : > { %v519_v60 = vadd.f32 %v518_v45, %v412_v55  ;;  %v549_v0 = vmul.f32 %v527_v53, %v386_v57 }
  0xe5   : > { %v765_v51 = vpop.f32.mrf.mxu0 }
  0xe6   : > { %v540_v54 = vadd.f32 %v765_v51, %v437_v42  ;;  %v547_v7 = vmul.f32 %v519_v60, %v384_v62 }
  0xe7   : > { %v531_v56 = vpop.f32.mrf.mxu0 }
  0xe8   : > { %v552_v1 = vadd.f32 %v548_v58, %v540_v54  ;;  %v532_v2 = vadd.f32 %v531_v56, %v427_v50 }
  0xe9   : > { %v766_v63 = vpop.f32.mrf.mxu0 }
  0xea   : > { %v543_v3 = vadd.f32 %v766_v63, %v442_v30  ;;  %v556_v10 = vmax.f32 %v552_v1, 0.0  ;;  %v550_v11 = vadd.f32 %v546_v6, %v532_v2 }
  0xeb   : > { %v534_v5 = vpop.f32.mrf.mxu0 }
  0xec   : > { %v553_v8 = vadd.f32 %v549_v0, %v543_v3  ;;  %v535_v9 = vadd.f32 %v534_v5, %v432_v4  ;;  %v554_v16 = vmax.f32 %v550_v11, 0.0 }
  0xee   : > { %v557_v12 = vmax.f32 %v553_v8, 0.0  ;;  %v551_v13 = vadd.f32 %v547_v7, %v535_v9 }
  0xf0   : > { %v555_v14 = vmax.f32 %v551_v13, 0.0  ;;  %v559_v15 = vpack.c.bf16 %v557_v12, %v556_v10 }
  0xf2   : > { %768 = vmatpush3.bf16.msra.mxu1 %v559_v15  ;;  %v558_v17 = vpack.c.bf16 %v555_v14, %v554_v16 }
  0xf3   : > { %769 = vmatprep.subr.bf16.mxu1 %v925_v21 }
  0xf6   : > { %770 = vmatpush3.bf16.msra.mxu1 %v558_v17 }
  0xf9   : > { %772 = vmatmul.mubr.msk.bf16.vlgmr.msra.gmra.mxu1 %vm567_vm3, %v560_v18 }
 0x1b9   : > { %v605_v20 = vpop.f32.mrf.mxu1 }
 0x1ba   : > { %v606_v22 = vadd.f32 %v605_v20, %v565_v19 }
 0x1bb   : > { %v773_v21 = vpop.f32.mrf.mxu1 }
 0x1bc   : > { %612 = vst.msk [vmem:[%s314_s10] sm:$0xf] %vm611_vm4, %v606_v22 }
 0x1bd   : > { %v608_v23 = vpop.f32.mrf.mxu1 }
 0x1be   : > { %858 = shalt.err (!%p855_p5)
}
 0x1bf   : > { %s859_s22 = scalar_lea.hbm %s1101_s19, 64  ;;  %s863_s8 = scalar_lea.hbm %s1154_s7, 128 }
 0x1c0   : > { %p860_p6 = scmp.ne.s32.totalorder %s1101_s19, %s859_s22  ;;  %p864_p10 = scmp.lt.s32.totalorder %s1101_s19, %s1154_s7 }
 0x1c1   : > { %p865_p11 = scmp.lt.s32.totalorder %s863_s8, %s859_s22 }
 0x1c2   : > { %p861_p7 = pnand %p860_p6, %p1008_p4 }
 0x1c3   : > { %p866_p12 = por %p865_p11, %p864_p10 }
 0x1c4   : > { %p862_p9 = pneg %p861_p7 }
 0x1c6   : > { %p867_p13 = pnand %p866_p12, %p862_p9 }
 0x1c8   : > { %870 = shalt.err (!%p867_p13)
}
 0x1c9   : > { %776 = dma.vmem_to_hbm [thread:$0]  (%p1008_p4), %s1103_s12, 64, %s1101_s19, %s614_s27   ;;  %v774_v24 = vpop.f32.mrf.mxu1 }
 0x1ca PF: > { %p782_p0 = scmp.ge.s32.totalorder %s921_s29, 2  ;;  %s640_s16 = sand.u32 1, %s901_s24  }
 0x1cb   : > { %s641_s20 = scalar_lea.sflag [#allocation3], %s640_s16 }
 0x1cc   : > { %p779_p1 = pnand %p782_p0, %p1015_p8 }
 0x1ce   : > { %p780_p2 = pneg %p779_p1 }
 0x1d0   : > { %896 = dma.done.wait (%p780_p2), %s641_s20, 64  }
 0x1d1   : > { %898 = vsyncadd (%p780_p2), %s641_s20, 4294967232  ;;  %s20_s29 = sadd.s32 1, %s921_s29   ;;  %s1157_s24 = smov %s905_s25 }
 0x1d2   : > { %p17_p3 = scmp.ge.s32.totalorder %s20_s29, 4   ;;  %s1158_s25 = smov %s909_s26 }
 0x1d3   : > { %s1159_s26 = smov %s1021_s14  ;;  %s1160_s27 = smov %s917_s28 }
 0x1d4   : > { %s1161_s28 = smov %s1163_s9  ;;  %19 = sbr.rel (!%p17_p3) target bundleno = 4 (0x4), region = 86 }
 0x1d9   :  { %646 = vsyncpa [#allocation3], 1 }
 0x1da   :  { %648 = vsyncpa [#allocation3 + $0x1], 1 }

</bundles_post_ra>
